<compile_context>
chip_gen: v7x
topology: tpu7x:2x2x1
jax: 0.10.0
libtpu: 0.0.40
codegen_flags: <defaults>
</compile_context>

<pallas_src>
import functools

import numpy as np
import jax
import jax.numpy as jnp
from jax import lax
from jax.experimental import pallas as pl
from jax.experimental.pallas import tpu as pltpu

LN_EPS = 1e-5
KV_K = 4                 # kv_kernel_size
KV_S = 4                 # kv_stride
NUM_TAPS = KV_K * KV_K   # 16 depthwise-conv taps


def _layernorm_cn(x, w, b):
    """LayerNorm over the channel axis of a channel-major (C, T) tile."""
    mu = jnp.mean(x, axis=0, keepdims=True)
    xc = x - mu
    var = jnp.mean(xc * xc, axis=0, keepdims=True)
    return xc * lax.rsqrt(var + LN_EPS) * w + b


def _gelu_tanh(x):
    # tanh-approximate GELU: one EUP tanh instead of an erf polynomial on the VPU.
    c = 0.7978845608028654  # sqrt(2/pi)
    return 0.5 * x * (1.0 + jnp.tanh(c * (x + 0.044715 * x * x * x)))


def _head_mask(C, d):
    """Block-diagonal per-head mask, built in-kernel from iotas (no division)."""
    inv_d = 1.0 / float(d)
    r = jnp.floor((lax.broadcasted_iota(jnp.int32, (C, C), 0).astype(jnp.float32) + 0.5) * inv_d)
    c = jnp.floor((lax.broadcasted_iota(jnp.int32, (C, C), 1).astype(jnp.float32) + 0.5) * inv_d)
    return r == c


# --------------------------------------------------------------------------------------
# Pass 1: per-batch fused attention map.
#   kvmap (depthwise 4x4/stride-4 conv of norm1(x)) -> k, v -> ctx^T = mask(v @ softmax(k)^T)
#   W_eff = Wproj^T @ (scale * ctx^T) @ Wq^T ;  b_eff = Wproj^T @ (scale * ctx^T) @ bq + bproj
# Tiled (and accumulated) over the token axis so VMEM stays bounded for any N.
# --------------------------------------------------------------------------------------
def ctx_kernel(x_ref, ln1w_ref, ln1b_ref, taps_ref, wkv_fused_ref, bv_ref,
               wqT_ref, bq_ref, wprojT_ref, bproj_ref,
               weff_ref, beff_ref, kv_acc_ref, *, num_heads, scale, img_w):
    f32 = jnp.float32
    bf16 = jnp.bfloat16
    t = pl.program_id(1)
    TN = x_ref.shape[1]
    C = kv_acc_ref.shape[0]
    M = kv_acc_ref.shape[1]
    Wq_img = img_w // KV_S

    @pl.when(t == 0)
    def _():
        kv_acc_ref[...] = jnp.zeros_like(kv_acc_ref)

    # token-major (TN, C) tile -> lane-dense channel-major (C, TN) via the XLU
    x_cm = x_ref[0].astype(f32).T
    xn = _layernorm_cn(x_cm, ln1w_ref[...], ln1b_ref[...])

    base = lax.convert_element_type(t * TN, f32)
    inv_w = 1.0 / float(img_w)
    inv_s = 1.0 / float(KV_S)

    # per-token depthwise-conv tap weight, rebuilt in-kernel (no (C,N) HBM map):
    #   tap(n) = (row(n) % 4) * 4 + (col(n) % 4);  tapw[c, n] = wkv_taps[tap(n), c]
    nf = base + lax.broadcasted_iota(jnp.int32, (NUM_TAPS, TN), 1).astype(f32)
    ri = jnp.floor((nf + 0.5) * inv_w)
    cj = nf - ri * float(img_w)
    tap = (ri - jnp.floor((ri + 0.5) * inv_s) * float(KV_S)) * float(KV_K) + \
          (cj - jnp.floor((cj + 0.5) * inv_s) * float(KV_S))
    tap_oh = (tap == lax.broadcasted_iota(jnp.int32, (NUM_TAPS, TN), 0).astype(f32)).astype(f32)
    tapw = jnp.dot(taps_ref[...], tap_oh, preferred_element_type=f32)      # (C, TN)
    weighted = xn * tapw

    # 4x4/stride-4 window pooling matrix, rebuilt in-kernel (no (N,M) HBM matrix):
    #   win(n) = (row(n)//4) * Wq + col(n)//4 ;  pool[n, m] = (win(n) == m)
    nf2 = base + lax.broadcasted_iota(jnp.int32, (TN, M), 0).astype(f32)
    ri2 = jnp.floor((nf2 + 0.5) * inv_w)
    cj2 = nf2 - ri2 * float(img_w)
    win = jnp.floor((ri2 + 0.5) * inv_s) * float(Wq_img) + jnp.floor((cj2 + 0.5) * inv_s)
    pool = (win == lax.broadcasted_iota(jnp.int32, (TN, M), 1).astype(f32)).astype(bf16)
    # TODO(synk): for production shapes M = N/16 >= 128 this pooling matmul is lane-dense;
    # if M stays < 128 a VPU strided window-sum would avoid the masked accumulator store.
    kv_acc_ref[...] += jnp.dot(weighted.astype(bf16), pool, preferred_element_type=f32)

    @pl.when(t == pl.num_programs(1) - 1)
    def _():
        kvmap = kv_acc_ref[...]                                            # (C, M) f32
        # fused [wk | wv]: single matmul, slice into k / v (once per batch -> keep f32)
        kv = jnp.dot(wkv_fused_ref[...], kvmap, preferred_element_type=f32)  # (2C, M)
        k = kv[0:C, :]
        v = kv[C:2 * C, :] + bv_ref[...]
        # softmax over the kv-token axis (lanes), per channel
        kmax = jnp.max(k, axis=1, keepdims=True)
        ke = jnp.exp(k - kmax)
        ksoft = ke * pl.reciprocal(jnp.sum(ke, axis=1, keepdims=True), approx=True)
        # ctx^T[c_v, c_k] = sum_m v[c_v, m] * softmax(k)[c_k, m]
        ctxT = jnp.dot(v, ksoft.T, preferred_element_type=f32)             # (C, C)
        d = C // num_heads
        ctxT = jnp.where(_head_mask(C, d), ctxT, 0.0) * scale              # fold attn scale
        # fold q and proj projections (and their biases) into one effective map:
        #   att^T = Wproj^T @ ctx^T @ (Wq^T x + bq) + bproj  =  W_eff @ x + b_eff
        tmp = jnp.dot(ctxT, wqT_ref[...], preferred_element_type=f32)      # (C, C)
        weff_ref[0] = jnp.dot(wprojT_ref[...], tmp, preferred_element_type=f32)
        bq_ctx = jnp.dot(ctxT, bq_ref[...], preferred_element_type=f32)    # (C, 1)
        beff_ref[0] = jnp.dot(wprojT_ref[...], bq_ctx,
                              preferred_element_type=f32) + bproj_ref[...]


# --------------------------------------------------------------------------------------
# Pass 2: token-parallel path — norm1, fused attention (single matmul), residual,
# norm2, MLP.  Gridded over (batch, N-tiles); both axes are fully parallel.
# --------------------------------------------------------------------------------------
def token_kernel(x_ref, weff_ref, beff_ref, ln1w_ref, ln1b_ref, ln2w_ref, ln2b_ref,
                 wfc1T_ref, bfc1_ref, wfc2T_ref, bfc2_ref, o_ref):
    f32 = jnp.float32
    bf16 = jnp.bfloat16
    # TODO(synk): Block.__init__ defaults cpe=None / crpe=None and those submodules are not
    # provided; they are treated as identity / skipped, matching the reference forward.
    x_cm = x_ref[0].astype(f32).T                                          # (C, TN)

    # ---- norm1 + fused factorized attention (W_eff / b_eff precomputed in pass 1) ----
    xn = _layernorm_cn(x_cm, ln1w_ref[...], ln1b_ref[...])
    attT = jnp.dot(weff_ref[0].astype(bf16), xn.astype(bf16),
                   preferred_element_type=f32) + beff_ref[0]
    # proj_drop / drop_path have rate 0.0 -> identity.
    x1 = x_cm + attT

    # ---- norm2 + MLP ----
    xn2 = _layernorm_cn(x1, ln2w_ref[...], ln2b_ref[...])
    h = jnp.dot(wfc1T_ref[...], xn2.astype(bf16), preferred_element_type=f32) + bfc1_ref[...]
    h = _gelu_tanh(h)
    mlp = jnp.dot(wfc2T_ref[...], h.astype(bf16), preferred_element_type=f32) + bfc2_ref[...]

    # back to the token-major HBM layout (XLU transpose; avoids wrapper-level transposes)
    o_ref[0] = (x1 + mlp).T.astype(o_ref.dtype)


def _pick_tile(N, C, Ch, M, budget_bytes=16 * 1024 * 1024):
    """Largest token tile whose estimated VMEM footprint fits a conservative budget
    (<= half of the 32 MiB scoped limit we request, safe for v5e/v6e/v7x)."""
    cands = [N] + [t for t in (4096, 2048, 1024, 512, 256, 128) if t < N and N % t == 0]
    for tn in cands:
        est = (4 * tn * C * 4          # double-buffered token-major in/out tiles (f32)
               + 12 * tn * C * 4       # channel-major (C,TN) intermediates
               + 3 * tn * Ch * 4       # fc1 / GELU intermediate
               + tn * M * 8            # in-kernel pool one-hot + iota temps
               + 8 * C * Ch            # double-buffered bf16 MLP weights
               + 4 * C * M + 24 * C * C)
        if est <= budget_bytes:
            return tn
    return cands[-1]


def block_forward(x, params, hw_shape, num_heads=8, tile_n=None):
    B, N, C = x.shape
    H, W = hw_shape
    assert N == H * W and H % KV_S == 0 and W % KV_S == 0 and C % num_heads == 0
    M = (H // KV_S) * (W // KV_S)
    Ch = params["wfc1"].shape[1]
    d = C // num_heads
    scale = float(d) ** -0.5
    TN = tile_n if tile_n is not None else _pick_tile(N, C, Ch, M)
    assert N % TN == 0
    NT = N // TN

    f32, bf16 = jnp.float32, jnp.bfloat16
    col = lambda p: jnp.reshape(p, (-1, 1)).astype(f32)                    # (1,K) -> (K,1)
    # grid-invariant operands (weights / biases / LN params); on v7x these could be
    # single-buffered via pipeline_mode to halve resident weight VMEM for large C/Ch.
    inv = lambda *shape: pl.BlockSpec(shape, lambda b, t: (0,) * len(shape))
    x_spec = pl.BlockSpec((1, TN, C), lambda b, t: (b, t, 0))

    taps_ct = params["wkv_taps"].T.astype(f32)                             # (C, 16)
    wkv_fusedT = jnp.concatenate([params["wk"], params["wv"]], axis=1).T.astype(f32)  # (2C, C)
    wqT = params["wq"].T.astype(f32)
    wprojT = params["wproj"].T.astype(f32)
    wfc1T = params["wfc1"].T.astype(bf16)
    wfc2T = params["wfc2"].T.astype(bf16)

    cparams = lambda sem: pltpu.CompilerParams(
        dimension_semantics=sem, vmem_limit_bytes=32 * 1024 * 1024)

    # ---- pass 1: per-batch fused attention weights W_eff / b_eff (N-tiled reduction) ----
    # TODO(synk): on v7x (2 TensorCores) a B=1 call leaves one core idle here; the pass is
    # tiny after removing the tap-map / pool DMAs, so the simple (B, NT) grid is kept.
    weff, beff = pl.pallas_call(
        functools.partial(ctx_kernel, num_heads=num_heads, scale=scale, img_w=W),
        out_shape=(jax.ShapeDtypeStruct((B, C, C), f32),
                   jax.ShapeDtypeStruct((B, C, 1), f32)),
        grid=(B, NT),
        in_specs=[
            x_spec,
            inv(C, 1), inv(C, 1),             # ln1 w, b
            inv(C, NUM_TAPS),                 # depthwise-conv tap weights
            inv(2 * C, C),                    # [wk | wv]^T
            inv(C, 1),                        # bv
            inv(C, C), inv(C, 1),             # wq^T, bq
            inv(C, C), inv(C, 1),             # wproj^T, bproj
        ],
        out_specs=(pl.BlockSpec((1, C, C), lambda b, t: (b, 0, 0)),
                   pl.BlockSpec((1, C, 1), lambda b, t: (b, 0, 0))),
        scratch_shapes=[pltpu.VMEM((C, M), jnp.float32)],
        compiler_params=cparams(("parallel", "arbitrary")),
    )(x, col(params["ln1_w"]), col(params["ln1_b"]), taps_ct, wkv_fusedT,
      col(params["bv"]), wqT, col(params["bq"]), wprojT, col(params["bproj"]))

    # ---- pass 2: token-parallel fused attention + residual + norm2 + MLP ----
    out = pl.pallas_call(
        token_kernel,
        out_shape=jax.ShapeDtypeStruct((B, N, C), x.dtype),
        grid=(B, NT),
        in_specs=[
            x_spec,
            pl.BlockSpec((1, C, C), lambda b, t: (b, 0, 0)),
            pl.BlockSpec((1, C, 1), lambda b, t: (b, 0, 0)),
            inv(C, 1), inv(C, 1),             # ln1 w, b
            inv(C, 1), inv(C, 1),             # ln2 w, b
            inv(Ch, C), inv(Ch, 1),           # fc1
            inv(C, Ch), inv(C, 1),            # fc2
        ],
        out_specs=x_spec,
        compiler_params=cparams(("parallel", "parallel")),
    )(x, weff, beff,
      col(params["ln1_w"]), col(params["ln1_b"]),
      col(params["ln2_w"]), col(params["ln2_b"]),
      wfc1T, col(params["bfc1"]), wfc2T, col(params["bfc2"]))

    return out


def init_params(key, C, num_heads, mlp_ratio=4):
    """Deterministic synthetic weights.  Matmul weights are stored as (in, out);
    wkv_taps[t, c] is the depthwise conv weight for tap t = p*4 + q of channel c."""
    Ch = C * mlp_ratio
    ks = jax.random.split(key, 16)
    n = lambda k, shape, s: jax.random.normal(k, shape, jnp.float32) * s
    return dict(
        ln1_w=1.0 + 0.1 * jax.random.normal(ks[0], (1, C), jnp.float32),
        ln1_b=0.05 * jax.random.normal(ks[1], (1, C), jnp.float32),
        wq=n(ks[2], (C, C), C ** -0.5),
        bq=n(ks[3], (1, C), 0.02),
        wkv_taps=n(ks[4], (NUM_TAPS, C), 0.25),
        wk=n(ks[5], (C, C), C ** -0.5),
        wv=n(ks[6], (C, C), C ** -0.5),
        bv=n(ks[7], (1, C), 0.02),
        wproj=n(ks[8], (C, C), C ** -0.5),
        bproj=n(ks[9], (1, C), 0.02),
        ln2_w=1.0 + 0.1 * jax.random.normal(ks[10], (1, C), jnp.float32),
        ln2_b=0.05 * jax.random.normal(ks[11], (1, C), jnp.float32),
        wfc1=n(ks[12], (C, Ch), C ** -0.5),
        bfc1=n(ks[13], (1, Ch), 0.02),
        wfc2=n(ks[14], (Ch, C), Ch ** -0.5),
        bfc2=n(ks[15], (1, C), 0.02),
    )


def block_reference(x, params, hw_shape, num_heads):
    """Pure-JAX f32 reference mirroring the PyTorch forward (drops=0, cpe/crpe=None)."""
    H, W = hw_shape
    B, N, C = x.shape
    d = C // num_heads
    scale = float(d) ** -0.5
    hi = "highest"
    ln = lambda y, w, b: (y - y.mean(-1, keepdims=True)) / jnp.sqrt(
        y.var(-1, keepdims=True) + LN_EPS) * w + b

    res1 = x
    xn = ln(x, params["ln1_w"], params["ln1_b"])
    q = jnp.einsum("bnc,cd->bnd", xn, params["wq"], precision=hi) + params["bq"]
    x6 = xn.reshape(B, H // KV_S, KV_S, W // KV_S, KV_S, C)
    wkv = params["wkv_taps"].reshape(KV_K, KV_K, C)
    kvmap = jnp.einsum("bipjqc,pqc->bijc", x6, wkv, precision=hi).reshape(B, -1, C)
    k = jnp.einsum("bmc,cd->bmd", kvmap, params["wk"], precision=hi)
    v = jnp.einsum("bmc,cd->bmd", kvmap, params["wv"], precision=hi) + params["bv"]
    Mtok = kvmap.shape[1]

    qh = q.reshape(B, N, num_heads, d).transpose(0, 2, 1, 3)
    kh = k.reshape(B, Mtok, num_heads, d).transpose(0, 2, 1, 3)
    vh = v.reshape(B, Mtok, num_heads, d).transpose(0, 2, 1, 3)
    ksoft = jax.nn.softmax(kh, axis=2)
    ctx = jnp.einsum("bhnk,bhnv->bhkv", ksoft, vh, precision=hi)
    att = scale * jnp.einsum("bhnk,bhkv->bhnv", qh, ctx, precision=hi)
    att = att.transpose(0, 2, 1, 3).reshape(B, N, C)
    att = jnp.einsum("bnc,cd->bnd", att, params["wproj"], precision=hi) + params["bproj"]
    x1 = res1 + att

    xn2 = ln(x1, params["ln2_w"], params["ln2_b"])
    h = jax.nn.gelu(jnp.einsum("bnc,cd->bnd", xn2, params["wfc1"], precision=hi)
                    + params["bfc1"], approximate=False)
    mlp = jnp.einsum("bnd,dc->bnc", h, params["wfc2"], precision=hi) + params["bfc2"]
    return x1 + mlp


if __name__ == "__main__":
    B, C, H, W = 2, 32, 16, 16     # dim=32, num_heads=8 -> head_dim=4
    num_heads = 8
    N = H * W

    key = jax.random.PRNGKey(0)
    kx, kp = jax.random.split(key)
    x = jax.random.normal(kx, (B, N, C), jnp.float32)
    params = init_params(kp, C, num_heads)

    ref = jax.block_until_ready(block_reference(x, params, (H, W), num_heads))

    # default tile: whole sequence resident (NT=1, no reduction axis)
    out = jax.block_until_ready(block_forward(x, params, (H, W), num_heads=num_heads))
    np.testing.assert_allclose(np.asarray(out), np.asarray(ref), rtol=3e-2, atol=3e-2)

    # also exercise the N-tiled accumulation path (N=256 -> 2 tiles)
    out_t = jax.block_until_ready(
        block_forward(x, params, (H, W), num_heads=num_heads, tile_n=128))
    np.testing.assert_allclose(np.asarray(out_t), np.asarray(ref), rtol=3e-2, atol=3e-2)

    print("KERNEL_OK")
</pallas_src>

<mosaic_0001>
module attributes {stable_mosaic.version = 11 : i64} {
  func.func @ctx_kernel(%arg0: i32, %arg1: i32, %arg2: memref<1x256x32xf32, #tpu.memory_space<vmem>>, %arg3: memref<32x1xf32, #tpu.memory_space<vmem>>, %arg4: memref<32x1xf32, #tpu.memory_space<vmem>>, %arg5: memref<32x16xf32, #tpu.memory_space<vmem>>, %arg6: memref<64x32xf32, #tpu.memory_space<vmem>>, %arg7: memref<32x1xf32, #tpu.memory_space<vmem>>, %arg8: memref<32x32xf32, #tpu.memory_space<vmem>>, %arg9: memref<32x1xf32, #tpu.memory_space<vmem>>, %arg10: memref<32x32xf32, #tpu.memory_space<vmem>>, %arg11: memref<32x1xf32, #tpu.memory_space<vmem>>, %arg12: memref<1x32x32xf32, #tpu.memory_space<vmem>>, %arg13: memref<1x32x1xf32, #tpu.memory_space<vmem>>, %arg14: memref<32x16xf32, #tpu.memory_space<vmem>>) attributes {dimension_semantics = [#tpu.dimension_semantics<parallel>, #tpu.dimension_semantics<arbitrary>], iteration_bounds = array<i64: 2, 1>, scalar_prefetch = 0 : i64, scratch_operands = 1 : i64, tpu.core_type = #tpu.core_type<tc>, window_params = [{transform_indices = @transform_0, window_bounds = array<i64: 1, 256, 32>}, {pipeline_mode = #tpu.pipeline_mode<synchronous>, transform_indices = @transform_1, window_bounds = array<i64: 32, 1>}, {pipeline_mode = #tpu.pipeline_mode<synchronous>, transform_indices = @transform_2, window_bounds = array<i64: 32, 1>}, {pipeline_mode = #tpu.pipeline_mode<synchronous>, transform_indices = @transform_3, window_bounds = array<i64: 32, 16>}, {pipeline_mode = #tpu.pipeline_mode<synchronous>, transform_indices = @transform_4, window_bounds = array<i64: 64, 32>}, {pipeline_mode = #tpu.pipeline_mode<synchronous>, transform_indices = @transform_5, window_bounds = array<i64: 32, 1>}, {pipeline_mode = #tpu.pipeline_mode<synchronous>, transform_indices = @transform_6, window_bounds = array<i64: 32, 32>}, {pipeline_mode = #tpu.pipeline_mode<synchronous>, transform_indices = @transform_7, window_bounds = array<i64: 32, 1>}, {pipeline_mode = #tpu.pipeline_mode<synchronous>, transform_indices = @transform_8, window_bounds = array<i64: 32, 32>}, {pipeline_mode = #tpu.pipeline_mode<synchronous>, transform_indices = @transform_9, window_bounds = array<i64: 32, 1>}, {transform_indices = @transform_10, window_bounds = array<i64: 1, 32, 32>}, {transform_indices = @transform_11, window_bounds = array<i64: 1, 32, 1>}]} {
    %c0_i32 = arith.constant 0 : i32
    %0 = arith.cmpi eq, %arg1, %c0_i32 : i32
    %1 = arith.extui %0 : i1 to i32
    %c0_i32_0 = arith.constant 0 : i32
    %2 = arith.cmpi ne, %1, %c0_i32_0 : i32
    scf.if %2 {
      %cst_39 = arith.constant 0.000000e+00 : f32
      %108 = vector.broadcast %cst_39 : f32 to vector<32x16xf32>
      %c0_40 = arith.constant 0 : index
      %c0_41 = arith.constant 0 : index
      %109 = vector.load %arg14[%c0_40, %c0_41] : memref<32x16xf32, #tpu.memory_space<vmem>>, vector<32x16xf32>
      tpu.vector_store %arg14[%c0_40, %c0_41], %108 {strides = array<i32>} : memref<32x16xf32, #tpu.memory_space<vmem>>, vector<32x16xf32>,
    } else {
    }
    %c0 = arith.constant 0 : index
    %c0_1 = arith.constant 0 : index
    %c0_2 = arith.constant 0 : index
    %3 = vector.load %arg2[%c0, %c0_1, %c0_2] : memref<1x256x32xf32, #tpu.memory_space<vmem>>, vector<1x256x32xf32>
    %4 = vector.shape_cast %3 : vector<1x256x32xf32> to vector<256x32xf32>
    %5 = tpu.transpose %4, [1, 0] : vector<256x32xf32> -> vector<32x256xf32>
    %c0_3 = arith.constant 0 : index
    %c0_4 = arith.constant 0 : index
    %6 = vector.load %arg3[%c0_3, %c0_4] : memref<32x1xf32, #tpu.memory_space<vmem>>, vector<32x1xf32>
    %c0_5 = arith.constant 0 : index
    %c0_6 = arith.constant 0 : index
    %7 = vector.load %arg4[%c0_5, %c0_6] : memref<32x1xf32, #tpu.memory_space<vmem>>, vector<32x1xf32>
    %cst = arith.constant dense<0.000000e+00> : vector<256xf32>
    %8 = vector.multi_reduction <add>, %5, %cst [0] : vector<32x256xf32> to vector<256xf32>
    %9 = vector.shape_cast %8 : vector<256xf32> to vector<1x256xf32>
    %cst_7 = arith.constant 3.200000e+01 : f32
    %10 = vector.broadcast %cst_7 : f32 to vector<1x256xf32>
    %11 = arith.divf %9, %10 : vector<1x256xf32>
    %12 = vector.broadcast %11 : vector<1x256xf32> to vector<32x256xf32>
    %13 = arith.subf %5, %12 : vector<32x256xf32>
    %14 = arith.mulf %13, %13 : vector<32x256xf32>
    %cst_8 = arith.constant dense<0.000000e+00> : vector<256xf32>
    %15 = vector.multi_reduction <add>, %14, %cst_8 [0] : vector<32x256xf32> to vector<256xf32>
    %16 = vector.shape_cast %15 : vector<256xf32> to vector<1x256xf32>
    %cst_9 = arith.constant 3.200000e+01 : f32
    %17 = vector.broadcast %cst_9 : f32 to vector<1x256xf32>
    %18 = arith.divf %16, %17 : vector<1x256xf32>
    %cst_10 = arith.constant 9.99999974E-6 : f32
    %19 = vector.broadcast %cst_10 : f32 to vector<1x256xf32>
    %20 = arith.addf %18, %19 : vector<1x256xf32>
    %21 = math.rsqrt %20 : vector<1x256xf32>
    %22 = vector.broadcast %21 : vector<1x256xf32> to vector<32x256xf32>
    %23 = arith.mulf %13, %22 : vector<32x256xf32>
    %24 = vector.broadcast %6 : vector<32x1xf32> to vector<32x256xf32>
    %25 = arith.mulf %23, %24 : vector<32x256xf32>
    %26 = vector.broadcast %7 : vector<32x1xf32> to vector<32x256xf32>
    %27 = arith.addf %25, %26 : vector<32x256xf32>
    %c256_i32 = arith.constant 256 : i32
    %28 = arith.muli %arg1, %c256_i32 : i32
    %29 = arith.sitofp %28 : i32 to f32
    %30 = tpu.iota {dimensions = array<i32: 1>} : vector<16x256xi32>
    %31 = arith.sitofp %30 : vector<16x256xi32> to vector<16x256xf32>
    %32 = vector.broadcast %29 : f32 to vector<16x256xf32>
    %33 = arith.addf %32, %31 : vector<16x256xf32>
    %cst_11 = arith.constant 5.000000e-01 : f32
    %34 = vector.broadcast %cst_11 : f32 to vector<16x256xf32>
    %35 = arith.addf %33, %34 : vector<16x256xf32>
    %cst_12 = arith.constant 6.250000e-02 : f32
    %36 = vector.broadcast %cst_12 : f32 to vector<16x256xf32>
    %37 = arith.mulf %35, %36 : vector<16x256xf32>
    %38 = math.floor %37 : vector<16x256xf32>
    %cst_13 = arith.constant 1.600000e+01 : f32
    %39 = vector.broadcast %cst_13 : f32 to vector<16x256xf32>
    %40 = arith.mulf %38, %39 : vector<16x256xf32>
    %41 = arith.subf %33, %40 : vector<16x256xf32>
    %cst_14 = arith.constant 5.000000e-01 : f32
    %42 = vector.broadcast %cst_14 : f32 to vector<16x256xf32>
    %43 = arith.addf %38, %42 : vector<16x256xf32>
    %cst_15 = arith.constant 2.500000e-01 : f32
    %44 = vector.broadcast %cst_15 : f32 to vector<16x256xf32>
    %45 = arith.mulf %43, %44 : vector<16x256xf32>
    %46 = math.floor %45 : vector<16x256xf32>
    %cst_16 = arith.constant 4.000000e+00 : f32
    %47 = vector.broadcast %cst_16 : f32 to vector<16x256xf32>
    %48 = arith.mulf %46, %47 : vector<16x256xf32>
    %49 = arith.subf %38, %48 : vector<16x256xf32>
    %cst_17 = arith.constant 4.000000e+00 : f32
    %50 = vector.broadcast %cst_17 : f32 to vector<16x256xf32>
    %51 = arith.mulf %49, %50 : vector<16x256xf32>
    %cst_18 = arith.constant 5.000000e-01 : f32
    %52 = vector.broadcast %cst_18 : f32 to vector<16x256xf32>
    %53 = arith.addf %41, %52 : vector<16x256xf32>
    %cst_19 = arith.constant 2.500000e-01 : f32
    %54 = vector.broadcast %cst_19 : f32 to vector<16x256xf32>
    %55 = arith.mulf %53, %54 : vector<16x256xf32>
    %56 = math.floor %55 : vector<16x256xf32>
    %cst_20 = arith.constant 4.000000e+00 : f32
    %57 = vector.broadcast %cst_20 : f32 to vector<16x256xf32>
    %58 = arith.mulf %56, %57 : vector<16x256xf32>
    %59 = arith.subf %41, %58 : vector<16x256xf32>
    %60 = arith.addf %51, %59 : vector<16x256xf32>
    %61 = tpu.iota {dimensions = array<i32: 0>} : vector<16x256xi32>
    %62 = arith.sitofp %61 : vector<16x256xi32> to vector<16x256xf32>
    %63 = arith.cmpf oeq, %60, %62 : vector<16x256xf32>
    %64 = arith.extui %63 : vector<16x256xi1> to vector<16x256xi32>
    %65 = arith.sitofp %64 : vector<16x256xi32> to vector<16x256xf32>
    %c0_21 = arith.constant 0 : index
    %c0_22 = arith.constant 0 : index
    %66 = vector.load %arg5[%c0_21, %c0_22] : memref<32x16xf32, #tpu.memory_space<vmem>>, vector<32x16xf32>
    %cst_23 = arith.constant dense<0.000000e+00> : vector<32x256xf32>
    %67 = tpu.matmul %66, %65, %cst_23 {dimension_numbers = #tpu.dot_dimension_numbers<[1], [0], [0], [1], [0, 0, 1, 1], [], []>} : vector<32x16xf32>, vector<16x256xf32>, vector<32x256xf32> -> vector<32x256xf32>
    %68 = arith.mulf %27, %67 : vector<32x256xf32>
    %69 = tpu.iota {dimensions = array<i32: 0>} : vector<256x16xi32>
    %70 = arith.sitofp %69 : vector<256x16xi32> to vector<256x16xf32>
    %71 = vector.broadcast %29 : f32 to vector<256x16xf32>
    %72 = arith.addf %71, %70 : vector<256x16xf32>
    %cst_24 = arith.constant 5.000000e-01 : f32
    %73 = vector.broadcast %cst_24 : f32 to vector<256x16xf32>
    %74 = arith.addf %72, %73 : vector<256x16xf32>
    %cst_25 = arith.constant 6.250000e-02 : f32
    %75 = vector.broadcast %cst_25 : f32 to vector<256x16xf32>
    %76 = arith.mulf %74, %75 : vector<256x16xf32>
    %77 = math.floor %76 : vector<256x16xf32>
    %cst_26 = arith.constant 1.600000e+01 : f32
    %78 = vector.broadcast %cst_26 : f32 to vector<256x16xf32>
    %79 = arith.mulf %77, %78 : vector<256x16xf32>
    %80 = arith.subf %72, %79 : vector<256x16xf32>
    %cst_27 = arith.constant 5.000000e-01 : f32
    %81 = vector.broadcast %cst_27 : f32 to vector<256x16xf32>
    %82 = arith.addf %77, %81 : vector<256x16xf32>
    %cst_28 = arith.constant 2.500000e-01 : f32
    %83 = vector.broadcast %cst_28 : f32 to vector<256x16xf32>
    %84 = arith.mulf %82, %83 : vector<256x16xf32>
    %85 = math.floor %84 : vector<256x16xf32>
    %cst_29 = arith.constant 4.000000e+00 : f32
    %86 = vector.broadcast %cst_29 : f32 to vector<256x16xf32>
    %87 = arith.mulf %85, %86 : vector<256x16xf32>
    %cst_30 = arith.constant 5.000000e-01 : f32
    %88 = vector.broadcast %cst_30 : f32 to vector<256x16xf32>
    %89 = arith.addf %80, %88 : vector<256x16xf32>
    %cst_31 = arith.constant 2.500000e-01 : f32
    %90 = vector.broadcast %cst_31 : f32 to vector<256x16xf32>
    %91 = arith.mulf %89, %90 : vector<256x16xf32>
    %92 = math.floor %91 : vector<256x16xf32>
    %93 = arith.addf %87, %92 : vector<256x16xf32>
    %94 = tpu.iota {dimensions = array<i32: 1>} : vector<256x16xi32>
    %95 = arith.sitofp %94 : vector<256x16xi32> to vector<256x16xf32>
    %96 = arith.cmpf oeq, %93, %95 : vector<256x16xf32>
    %97 = arith.extui %96 : vector<256x16xi1> to vector<256x16xi32>
    %98 = arith.sitofp %97 : vector<256x16xi32> to vector<256x16xf32>
    %99 = arith.truncf %98 : vector<256x16xf32> to vector<256x16xbf16>
    %c0_32 = arith.constant 0 : index
    %c0_33 = arith.constant 0 : index
    %100 = vector.load %arg14[%c0_32, %c0_33] : memref<32x16xf32, #tpu.memory_space<vmem>>, vector<32x16xf32>
    %101 = arith.truncf %68 : vector<32x256xf32> to vector<32x256xbf16>
    %cst_34 = arith.constant dense<0.000000e+00> : vector<32x16xf32>
    %102 = tpu.matmul %101, %99, %cst_34 {dimension_numbers = #tpu.dot_dimension_numbers<[1], [0], [0], [1], [0, 0, 1, 1], [], []>} : vector<32x256xbf16>, vector<256x16xbf16>, vector<32x16xf32> -> vector<32x16xf32>
    %103 = arith.addf %100, %102 : vector<32x16xf32>
    %c0_35 = arith.constant 0 : index
    %c0_36 = arith.constant 0 : index
    %104 = vector.load %arg14[%c0_35, %c0_36] : memref<32x16xf32, #tpu.memory_space<vmem>>, vector<32x16xf32>
    tpu.vector_store %arg14[%c0_35, %c0_36], %103 {strides = array<i32>} : memref<32x16xf32, #tpu.memory_space<vmem>>, vector<32x16xf32>,
    %c0_i32_37 = arith.constant 0 : i32
    %105 = arith.cmpi eq, %arg1, %c0_i32_37 : i32
    %106 = arith.extui %105 : i1 to i32
    %c0_i32_38 = arith.constant 0 : i32
    %107 = arith.cmpi ne, %106, %c0_i32_38 : i32
    scf.if %107 {
      %c0_39 = arith.constant 0 : index
      %c0_40 = arith.constant 0 : index
      %108 = vector.load %arg14[%c0_39, %c0_40] : memref<32x16xf32, #tpu.memory_space<vmem>>, vector<32x16xf32>
      %c0_41 = arith.constant 0 : index
      %c0_42 = arith.constant 0 : index
      %109 = vector.load %arg6[%c0_41, %c0_42] : memref<64x32xf32, #tpu.memory_space<vmem>>, vector<64x32xf32>
      %cst_43 = arith.constant dense<0.000000e+00> : vector<64x16xf32>
      %110 = tpu.matmul %109, %108, %cst_43 {dimension_numbers = #tpu.dot_dimension_numbers<[1], [0], [0], [1], [0, 0, 1, 1], [], []>} : vector<64x32xf32>, vector<32x16xf32>, vector<64x16xf32> -> vector<64x16xf32>
      %111 = vector.extract_strided_slice %110 {offsets = [0, 0], sizes = [32, 16], strides = [1, 1]} : vector<64x16xf32> to vector<32x16xf32>
      %112 = vector.extract_strided_slice %110 {offsets = [32, 0], sizes = [32, 16], strides = [1, 1]} : vector<64x16xf32> to vector<32x16xf32>
      %c0_44 = arith.constant 0 : index
      %c0_45 = arith.constant 0 : index
      %113 = vector.load %arg7[%c0_44, %c0_45] : memref<32x1xf32, #tpu.memory_space<vmem>>, vector<32x1xf32>
      %114 = vector.broadcast %113 : vector<32x1xf32> to vector<32x16xf32>
      %115 = arith.addf %112, %114 : vector<32x16xf32>
      %cst_46 = arith.constant dense<0xFF800000> : vector<32xf32>
      %116 = vector.multi_reduction <maximumf>, %111, %cst_46 [1] : vector<32x16xf32> to vector<32xf32>
      %117 = vector.shape_cast %116 : vector<32xf32> to vector<32x1xf32>
      %118 = vector.broadcast %117 : vector<32x1xf32> to vector<32x16xf32>
      %119 = arith.subf %111, %118 : vector<32x16xf32>
      %120 = math.exp %119 : vector<32x16xf32>
      %cst_47 = arith.constant dense<0.000000e+00> : vector<32xf32>
      %121 = vector.multi_reduction <add>, %120, %cst_47 [1] : vector<32x16xf32> to vector<32xf32>
      %122 = vector.shape_cast %121 : vector<32xf32> to vector<32x1xf32>
      %123 = tpu.reciprocal %122 {approx = true} : vector<32x1xf32> -> vector<32x1xf32>
      %124 = vector.broadcast %123 : vector<32x1xf32> to vector<32x16xf32>
      %125 = arith.mulf %120, %124 : vector<32x16xf32>
      %126 = tpu.transpose %125, [1, 0] : vector<32x16xf32> -> vector<16x32xf32>
      %cst_48 = arith.constant dense<0.000000e+00> : vector<32x32xf32>
      %127 = tpu.matmul %115, %126, %cst_48 {dimension_numbers = #tpu.dot_dimension_numbers<[1], [0], [0], [1], [0, 0, 1, 1], [], []>} : vector<32x16xf32>, vector<16x32xf32>, vector<32x32xf32> -> vector<32x32xf32>
      %128 = tpu.iota {dimensions = array<i32: 0>} : vector<32x32xi32>
      %129 = arith.sitofp %128 : vector<32x32xi32> to vector<32x32xf32>
      %cst_49 = arith.constant 5.000000e-01 : f32
      %130 = vector.broadcast %cst_49 : f32 to vector<32x32xf32>
      %131 = arith.addf %129, %130 : vector<32x32xf32>
      %cst_50 = arith.constant 2.500000e-01 : f32
      %132 = vector.broadcast %cst_50 : f32 to vector<32x32xf32>
      %133 = arith.mulf %131, %132 : vector<32x32xf32>
      %134 = math.floor %133 : vector<32x32xf32>
      %135 = tpu.iota {dimensions = array<i32: 1>} : vector<32x32xi32>
      %136 = arith.sitofp %135 : vector<32x32xi32> to vector<32x32xf32>
      %cst_51 = arith.constant 5.000000e-01 : f32
      %137 = vector.broadcast %cst_51 : f32 to vector<32x32xf32>
      %138 = arith.addf %136, %137 : vector<32x32xf32>
      %cst_52 = arith.constant 2.500000e-01 : f32
      %139 = vector.broadcast %cst_52 : f32 to vector<32x32xf32>
      %140 = arith.mulf %138, %139 : vector<32x32xf32>
      %141 = math.floor %140 : vector<32x32xf32>
      %142 = arith.cmpf oeq, %134, %141 : vector<32x32xf32>
      %cst_53 = arith.constant 0.000000e+00 : f32
      %143 = vector.broadcast %cst_53 : f32 to vector<32x32xf32>
      %144 = arith.select %142, %127, %143 : vector<32x32xi1>, vector<32x32xf32>
      %cst_54 = arith.constant 5.000000e-01 : f32
      %145 = vector.broadcast %cst_54 : f32 to vector<32x32xf32>
      %146 = arith.mulf %144, %145 : vector<32x32xf32>
      %c0_55 = arith.constant 0 : index
      %c0_56 = arith.constant 0 : index
      %147 = vector.load %arg8[%c0_55, %c0_56] : memref<32x32xf32, #tpu.memory_space<vmem>>, vector<32x32xf32>
      %cst_57 = arith.constant dense<0.000000e+00> : vector<32x32xf32>
      %148 = tpu.matmul %146, %147, %cst_57 {dimension_numbers = #tpu.dot_dimension_numbers<[1], [0], [0], [1], [0, 0, 1, 1], [], []>} : vector<32x32xf32>, vector<32x32xf32>, vector<32x32xf32> -> vector<32x32xf32>
      %c0_58 = arith.constant 0 : index
      %c0_59 = arith.constant 0 : index
      %149 = vector.load %arg10[%c0_58, %c0_59] : memref<32x32xf32, #tpu.memory_space<vmem>>, vector<32x32xf32>
      %cst_60 = arith.constant dense<0.000000e+00> : vector<32x32xf32>
      %150 = tpu.matmul %149, %148, %cst_60 {dimension_numbers = #tpu.dot_dimension_numbers<[1], [0], [0], [1], [0, 0, 1, 1], [], []>} : vector<32x32xf32>, vector<32x32xf32>, vector<32x32xf32> -> vector<32x32xf32>
      %c0_61 = arith.constant 0 : index
      %c0_62 = arith.constant 0 : index
      %c0_63 = arith.constant 0 : index
      %151 = vector.load %arg12[%c0_61, %c0_62, %c0_63] : memref<1x32x32xf32, #tpu.memory_space<vmem>>, vector<1x32x32xf32>
      %152 = vector.shape_cast %151 : vector<1x32x32xf32> to vector<32x32xf32>
      %153 = vector.shape_cast %150 : vector<32x32xf32> to vector<1x32x32xf32>
      tpu.vector_store %arg12[%c0_61, %c0_62, %c0_63], %153 {strides = array<i32>} : memref<1x32x32xf32, #tpu.memory_space<vmem>>, vector<1x32x32xf32>,
      %c0_64 = arith.constant 0 : index
      %c0_65 = arith.constant 0 : index
      %154 = vector.load %arg9[%c0_64, %c0_65] : memref<32x1xf32, #tpu.memory_space<vmem>>, vector<32x1xf32>
      %cst_66 = arith.constant dense<0.000000e+00> : vector<32x1xf32>
      %155 = tpu.matmul %146, %154, %cst_66 {dimension_numbers = #tpu.dot_dimension_numbers<[1], [0], [0], [1], [0, 0, 1, 1], [], []>} : vector<32x32xf32>, vector<32x1xf32>, vector<32x1xf32> -> vector<32x1xf32>
      %c0_67 = arith.constant 0 : index
      %c0_68 = arith.constant 0 : index
      %156 = vector.load %arg10[%c0_67, %c0_68] : memref<32x32xf32, #tpu.memory_space<vmem>>, vector<32x32xf32>
      %cst_69 = arith.constant dense<0.000000e+00> : vector<32x1xf32>
      %157 = tpu.matmul %156, %155, %cst_69 {dimension_numbers = #tpu.dot_dimension_numbers<[1], [0], [0], [1], [0, 0, 1, 1], [], []>} : vector<32x32xf32>, vector<32x1xf32>, vector<32x1xf32> -> vector<32x1xf32>
      %c0_70 = arith.constant 0 : index
      %c0_71 = arith.constant 0 : index
      %158 = vector.load %arg11[%c0_70, %c0_71] : memref<32x1xf32, #tpu.memory_space<vmem>>, vector<32x1xf32>
      %159 = arith.addf %157, %158 : vector<32x1xf32>
      %c0_72 = arith.constant 0 : index
      %c0_73 = arith.constant 0 : index
      %c0_74 = arith.constant 0 : index
      %160 = vector.load %arg13[%c0_72, %c0_73, %c0_74] : memref<1x32x1xf32, #tpu.memory_space<vmem>>, vector<1x32x1xf32>
      %161 = vector.shape_cast %160 : vector<1x32x1xf32> to vector<32x1xf32>
      %162 = vector.shape_cast %159 : vector<32x1xf32> to vector<1x32x1xf32>
      tpu.vector_store %arg13[%c0_72, %c0_73, %c0_74], %162 {strides = array<i32>} : memref<1x32x1xf32, #tpu.memory_space<vmem>>, vector<1x32x1xf32>,
    } else {
    }
    return
  }
  func.func @transform_0(%arg0: i32, %arg1: i32) -> (i32, i32, i32) {
    %c0_i32 = arith.constant 0 : i32
    %c0_i32_0 = arith.constant 0 : i32
    return %arg0, %arg1, %c0_i32 : i32, i32, i32
  }
  func.func @transform_1(%arg0: i32, %arg1: i32) -> (i32, i32) {
    %c0_i32 = arith.constant 0 : i32
    %c0_i32_0 = arith.constant 0 : i32
    %c0_i32_1 = arith.constant 0 : i32
    return %c0_i32, %c0_i32_0 : i32, i32
  }
  func.func @transform_2(%arg0: i32, %arg1: i32) -> (i32, i32) {
    %c0_i32 = arith.constant 0 : i32
    %c0_i32_0 = arith.constant 0 : i32
    %c0_i32_1 = arith.constant 0 : i32
    return %c0_i32, %c0_i32_0 : i32, i32
  }
  func.func @transform_3(%arg0: i32, %arg1: i32) -> (i32, i32) {
    %c0_i32 = arith.constant 0 : i32
    %c0_i32_0 = arith.constant 0 : i32
    %c0_i32_1 = arith.constant 0 : i32
    return %c0_i32, %c0_i32_0 : i32, i32
  }
  func.func @transform_4(%arg0: i32, %arg1: i32) -> (i32, i32) {
    %c0_i32 = arith.constant 0 : i32
    %c0_i32_0 = arith.constant 0 : i32
    %c0_i32_1 = arith.constant 0 : i32
    return %c0_i32, %c0_i32_0 : i32, i32
  }
  func.func @transform_5(%arg0: i32, %arg1: i32) -> (i32, i32) {
    %c0_i32 = arith.constant 0 : i32
    %c0_i32_0 = arith.constant 0 : i32
    %c0_i32_1 = arith.constant 0 : i32
    return %c0_i32, %c0_i32_0 : i32, i32
  }
  func.func @transform_6(%arg0: i32, %arg1: i32) -> (i32, i32) {
    %c0_i32 = arith.constant 0 : i32
    %c0_i32_0 = arith.constant 0 : i32
    %c0_i32_1 = arith.constant 0 : i32
    return %c0_i32, %c0_i32_0 : i32, i32
  }
  func.func @transform_7(%arg0: i32, %arg1: i32) -> (i32, i32) {
    %c0_i32 = arith.constant 0 : i32
    %c0_i32_0 = arith.constant 0 : i32
    %c0_i32_1 = arith.constant 0 : i32
    return %c0_i32, %c0_i32_0 : i32, i32
  }
  func.func @transform_8(%arg0: i32, %arg1: i32) -> (i32, i32) {
    %c0_i32 = arith.constant 0 : i32
    %c0_i32_0 = arith.constant 0 : i32
    %c0_i32_1 = arith.constant 0 : i32
    return %c0_i32, %c0_i32_0 : i32, i32
  }
  func.func @transform_9(%arg0: i32, %arg1: i32) -> (i32, i32) {
    %c0_i32 = arith.constant 0 : i32
    %c0_i32_0 = arith.constant 0 : i32
    %c0_i32_1 = arith.constant 0 : i32
    return %c0_i32, %c0_i32_0 : i32, i32
  }
  func.func @transform_10(%arg0: i32, %arg1: i32) -> (i32, i32, i32) {
    %c0_i32 = arith.constant 0 : i32
    %c0_i32_0 = arith.constant 0 : i32
    %c0_i32_1 = arith.constant 0 : i32
    return %arg0, %c0_i32, %c0_i32_0 : i32, i32, i32
  }
  func.func @transform_11(%arg0: i32, %arg1: i32) -> (i32, i32, i32) {
    %c0_i32 = arith.constant 0 : i32
    %c0_i32_0 = arith.constant 0 : i32
    %c0_i32_1 = arith.constant 0 : i32
    return %arg0, %c0_i32, %c0_i32_0 : i32, i32, i32
  }
}

</mosaic_0001>

<bundles_post_ra>
// kernel: tpu_custom_call.1
= control target key start
LH: loop header
LB: loop body
LE: loop exit
PB: predicated region body
PF: predicated region fallthrough
CT: control target
= control target key end

     0   :  { %s3646_s0 = inlined_call_operand.vmem [shape: f32[2,256,32], index: 0, kind: input, shape index: {}]   ;;  %s3647_s1 = inlined_call_operand.vmem [shape: f32[32,1], index: 1, kind: input, shape index: {}]   ;;  %s3648_s2 = inlined_call_operand.vmem [shape: f32[32,1], index: 2, kind: input, shape index: {}]   ;;  %s3649_s3 = inlined_call_operand.vmem [shape: f32[32,16], index: 3, kind: input, shape index: {}]   ;;  %s3650_s4 = inlined_call_operand.vmem [shape: f32[64,32], index: 4, kind: input, shape index: {}]   ;;  %s3651_s5 = inlined_call_operand.vmem [shape: f32[32,1], index: 5, kind: input, shape index: {}]   ;;  %s3652_s6 = inlined_call_operand.vmem [shape: f32[32,32], index: 6, kind: input, shape index: {}]   ;;  %s3653_s7 = inlined_call_operand.vmem [shape: f32[32,1], index: 7, kind: input, shape index: {}]   ;;  %s3654_s8 = inlined_call_operand.vmem [shape: f32[32,32], index: 8, kind: input, shape index: {}]   ;;  %s3655_s9 = inlined_call_operand.vmem [shape: f32[32,1], index: 9, kind: input, shape index: {}]   ;;  %s3656_s10 = inlined_call_operand.hbm [shape: f32[2,32,32], index: 10, kind: output, shape index: {0}]   ;;  %s3657_s11 = inlined_call_operand.vmem [shape: f32[2,32,1], index: 11, kind: output, shape index: {1}]  }
   0x1   :  { %3658 = sst [smem:[#allocation6_spill]] %s3646_s0 }
   0x2   :  { %3659 = sst [smem:[#allocation7_spill]] %s3647_s1 }
   0x3   :  { %3660 = sst [smem:[#allocation8_spill]] %s3648_s2 }
   0x4   :  { %3661 = sst [smem:[#allocation9_spill]] %s3649_s3 }
   0x5   :  { %17 = vsyncpa [#allocation4], 0 }
   0x6   :  { %19 = vsyncpa [#allocation4 + $0x1], 0  ;;  %s2986_s17 = smov 0   ;;  %s2988_s18 = smov 0  }
   0x7   :  { %s2990_s19 = smov 0   ;;  %s2992_s20 = smov 0  }
   0x8   :  { %s2994_s21 = smov 0   ;;  %s2996_s22 = smov 0  }
   0x9 LB: > { %s2406_s23 = sadd.s32 4294967295, %s2918_s22   ;;  %s2407_s24 = sadd.s32 4294967294, %s2918_s22   ;;  %s2918_s22 = sphi %s2996_s22, %s25_s22   ;;  %s2914_s21 = sphi %s2994_s21, %s3675_s21   ;;  %s2910_s20 = sphi %s2992_s20, %s3674_s20   ;;  %s2906_s19 = sphi %s2990_s19, %s3673_s19   ;;  %s2902_s18 = sphi %s2988_s18, %s3672_s18   ;;  %s2898_s17 = sphi %s2986_s17, %s3671_s17  }
   0xa   : > { %s37_s25 = sadd.s32 1, %s2914_s21  ;;  %s261_s26 = sadd.s32 1, %s2906_s19 }
   0xb   : > { %p39_p0 = scmp.ge.s32.totalorder %s37_s25, 2  ;;  %p271_p1 = scmp.ne.s32.totalorder %s2906_s19, %s2902_s18 }
   0xc   : > { %p272_p2 = scmp.eq.s32.totalorder %s2406_s23, 1  ;;  %p277_p3 = scmp.ne.s32.totalorder %s2902_s18, %s2898_s17 }
   0xd   : > { %s3677_s25 = smov (%p39_p0, %s37_s25), 0  ;;  %p278_p5 = scmp.eq.s32.totalorder %s2407_s24, 1 }
   0xe   : > { %p3026_p4 = por %p272_p2, %p271_p1  ;;  %s258_s28 = ssub.s32 %s2914_s21, %s3677_s25 }
   0xf   : > { %p2410_p6 = scmp.ge.s32.totalorder %s2918_s22, 1  ;;  %p259_p7 = scmp.eq.s32.totalorder %s258_s28, 0 }
  0x10   : > { %p3033_p8 = por %p278_p5, %p277_p3  ;;  %p362_p9 = scmp.lt.s32.totalorder %s2918_s22, 3 }
  0x11   : > { %s3039_s30 = scalar_select %p259_p7, %s2906_s19, %s261_s26  }
  0x12   : > { %p363_p10 = pnand %p2410_p6, %p362_p9 }
  0x13   : > { %p412_p11 = scmp.lt.s32.totalorder (!%p363_p10), %s2910_s20, 1  ;;  %v667_v0 = vlaneseq (!%p363_p10)  ;;  %vm431_vm0 = vcmask (!%p363_p10), 130048   ;;  %v2920_v1 = vmov (!%p363_p10), 0.0   ;;  %s3664_s0 = sld [smem:[#allocation6_spill]] (!%p363_p10)  ;;  %v2921_v58 = vmov (!%p363_p10), 1.0|1.0  }
  0x14   : > { %366 = sbr.rel (%p363_p10) target bundleno = 1740 (0x6cc), region = 60  ;;  %807 = vmatprep.mubr.f32.mxu0 (!%p363_p10), %v2920_v1  ;;  %432 = vst.msk [vmem:[#allocation2] sm:$0xff] (!%p363_p10), %vm431_vm0, %v2920_v1  ;;  %433 = vst.msk [vmem:[#allocation2 + $0x8] sm:$0xff] (!%p363_p10), %vm431_vm0, %v2920_v1  ;;  %s3665_s3 = sld [smem:[#allocation9_spill]] (!%p363_p10) }
  0x15   : > { %434 = vst.msk [vmem:[#allocation2 + $0x10] sm:$0xff] (!%p363_p10), %vm431_vm0, %v2920_v1  ;;  %435 = vst.msk [vmem:[#allocation2 + $0x18] sm:$0xff] (!%p363_p10), %vm431_vm0, %v2920_v1  ;;  %v668_v2 = vand.u32 (!%p363_p10), 127, %v667_v0  ;;  %v3073_v24 = vshrl.u32 (!%p363_p10), %v667_v0, 7  ;;  %s3666_s1 = sld [smem:[#allocation7_spill]] (!%p363_p10)  ;;  %s3667_s2 = sld [smem:[#allocation8_spill]] (!%p363_p10) }
  0x16   : > { %s2923_s15 = smov (!%p363_p10), [#allocation3]  }
  0x17   : > { %v669_v3 = vadd.s32 (!%p363_p10), 128, %v668_v2  ;;  %v3055_v4 = vcvt.s32.f32 (!%p363_p10), %v668_v2  ;;  %v711_v35 = vadd.s32 (!%p363_p10), 8, %v3073_v24  ;;  %v3081_v46 = vcvt.s32.f32 (!%p363_p10), %v3073_v24 }
  0x19   : > { %v671_v7 = vcvt.s32.f32 (!%p363_p10), %v669_v3  ;;  %v3065_v8 = vadd.f32 (!%p363_p10), 0.5, %v3055_v4  ;;  %v3085_v51 = vcvt.s32.f32 (!%p363_p10), %v711_v35 }
  0x1a   : > { %v726_v61 = vld [vmem:[%s3665_s3] sm:$0xff] (!%p363_p10)  ;;  %v727_v0 = vld [vmem:[%s3665_s3 + $0x8] sm:$0xff] (!%p363_p10) }
  0x1b   : > { %s3052_s12 = scalar_select %p412_p11, %s2910_s20, 1  ;;  %v676_v11 = vadd.f32 0.5, %v671_v7  ;;  %v677_v12 = vmul.f32 0.0625, %v3065_v8 }
  0x1d   : > { %s2529_s13 = sshll.u32 %s3052_s12, 8  ;;  %v678_v13 = vmul.f32 0.0625, %v676_v11  ;;  %v679_v14 = vfloor.f32 %v677_v12 }
  0x1e   : > { %s3060_s16 = scalar_lea.vmem %s3664_s0, %s2529_s13  ;;  %s2531_s13 = sshll.u32 %s2910_s20, 9 }
  0x1f   : > { %v452_v5 = vld [vmem:[%s3060_s16 + $0x80] sm:$0xff]  ;;  %v453_v9 = vld [vmem:[%s3060_s16 + $0x88] sm:$0xff]  ;;  %v454_v15 = vld [vmem:[%s3060_s16 + $0x90] sm:$0xff]  ;;  %v680_v17 = vfloor.f32 %v678_v13  ;;  %v681_v18 = vmul.f32 16.0, %v679_v14  ;;  %v685_v19 = vadd.f32 0.5, %v679_v14  ;;  %s3578_s23 = scalar_lea.hbm %s3656_s10, %s2531_s13 }
  0x20   : > { %v436_v6 = vld [vmem:[%s3060_s16] sm:$0xff]  ;;  %500 = vxpose.xlu0.b32.start [1/16] (narrow) %v452_v5, 32  ;;  %v437_v10 = vld [vmem:[%s3060_s16 + $0x8] sm:$0xff]  ;;  %v438_v16 = vld [vmem:[%s3060_s16 + $0x10] sm:$0xff] }
  0x21   : > { %468 = vxpose.xlu1.b32.start [1/16] (narrow) %v436_v6, 32  ;;  %v682_v20 = vmul.f32 16.0, %v680_v17  ;;  %v686_v21 = vadd.f32 0.5, %v680_v17  ;;  %v683_v22 = vsub.f32 %v3055_v4, %v681_v18  ;;  %v687_v23 = vmul.f32 0.25, %v685_v19  ;;  %v455_v25 = vld [vmem:[%s3060_s16 + $0x98] sm:$0xff]  ;;  %v456_v36 = vld [vmem:[%s3060_s16 + $0xa0] sm:$0xff] }
  0x22   : > { %v439_v26 = vld [vmem:[%s3060_s16 + $0x18] sm:$0xff]  ;;  %v440_v37 = vld [vmem:[%s3060_s16 + $0x20] sm:$0xff]  ;;  %v457_v47 = vld [vmem:[%s3060_s16 + $0xa8] sm:$0xff]  ;;  %v854_v19 = vadd.s32 128, %v3073_v24 }
  0x23   : > { %v684_v27 = vsub.f32 %v671_v7, %v682_v20  ;;  %v688_v28 = vmul.f32 0.25, %v686_v21  ;;  %v689_v29 = vfloor.f32 %v687_v23  ;;  %v697_v30 = vadd.f32 0.5, %v683_v22  ;;  %v441_v48 = vld [vmem:[%s3060_s16 + $0x28] sm:$0xff]  ;;  %v458_v55 = vld [vmem:[%s3060_s16 + $0xb0] sm:$0xff]  ;;  %v459_v59 = vld [vmem:[%s3060_s16 + $0xb8] sm:$0xff] }
  0x24   : > { %501 = vxpose.xlu0.b32.cont [2/16] (narrow) %v453_v9, 32  ;;  %v442_v56 = vld [vmem:[%s3060_s16 + $0x30] sm:$0xff]  ;;  %v443_v60 = vld [vmem:[%s3060_s16 + $0x38] sm:$0xff]  ;;  %v460_v62 = vld [vmem:[%s3060_s16 + $0xc0] sm:$0xff]  ;;  %v855_v20 = vadd.s32 136, %v3073_v24  ;;  %v884_v21 = vcvt.s32.f32 %v854_v19 }
  0x25   : > { %469 = vxpose.xlu1.b32.cont [2/16] (narrow) %v437_v10, 32  ;;  %v690_v31 = vfloor.f32 %v688_v28  ;;  %v698_v32 = vadd.f32 0.5, %v684_v27  ;;  %v691_v33 = vmul.f32 4.0, %v689_v29  ;;  %v699_v34 = vmul.f32 0.25, %v697_v30  ;;  %v444_v63 = vld [vmem:[%s3060_s16 + $0x40] sm:$0xff]  ;;  %v461_v2 = vld [vmem:[%s3060_s16 + $0xc8] sm:$0xff] }
  0x26   : > { %v445_v3 = vld [vmem:[%s3060_s16 + $0x48] sm:$0xff]  ;;  %v728_v5 = vld [vmem:[%s3665_s3 + $0x10] sm:$0xff]  ;;  %v729_v9 = vld [vmem:[%s3665_s3 + $0x18] sm:$0xff]  ;;  %v948_v23 = vadd.f32 0.5, %v884_v21  ;;  %v3141_v28 = vadd.f32 0.5, %v3081_v46  ;;  %v3144_v29 = vadd.f32 0.5, %v3085_v51 }
  0x27   : > { %v692_v38 = vmul.f32 4.0, %v690_v31  ;;  %v700_v39 = vmul.f32 0.25, %v698_v32  ;;  %v693_v40 = vsub.f32 %v679_v14, %v691_v33  ;;  %v701_v41 = vfloor.f32 %v699_v34  ;;  %v462_v6 = vld [vmem:[%s3060_s16 + $0xd0] sm:$0xff]  ;;  %v463_v10 = vld [vmem:[%s3060_s16 + $0xd8] sm:$0xff]  ;;  %v464_v12 = vld [vmem:[%s3060_s16 + $0xe0] sm:$0xff]  ;;  %s2844_s3 = sshll.u32 %s2923_s15, 4  ;;  %s2845_s3 = int_to_ptr.vmem [resolvable:$false] %s2844_s3 }
  0x28   : > { %502 = vxpose.xlu0.b32.cont [3/16] (narrow) %v454_v15, 32  ;;  %v446_v7 = vld [vmem:[%s3060_s16 + $0x50] sm:$0xff]  ;;  %v447_v11 = vld [vmem:[%s3060_s16 + $0x58] sm:$0xff]  ;;  %v448_v13 = vld [vmem:[%s3060_s16 + $0x60] sm:$0xff]  ;;  %v3147_v30 = vadd.s32 16, %v3073_v24  ;;  %v3150_v31 = vadd.s32 24, %v3073_v24 }
  0x29   : > { %470 = vxpose.xlu1.b32.cont [3/16] (narrow) %v438_v16, 32  ;;  %v694_v42 = vsub.f32 %v680_v17, %v692_v38  ;;  %v702_v43 = vfloor.f32 %v700_v39  ;;  %v695_v44 = vmul.f32 4.0, %v693_v40  ;;  %v703_v45 = vmul.f32 4.0, %v701_v41  ;;  %v449_v14 = vld [vmem:[%s3060_s16 + $0x68] sm:$0xff]  ;;  %v466_v15 = vld [vmem:[%s3060_s16 + $0xf0] sm:$0xff]  ;;  %v467_v17 = vld [vmem:[%s3060_s16 + $0xf8] sm:$0xff] }
  0x2a   : > { %v450_v16 = vld [vmem:[%s3060_s16 + $0x70] sm:$0xff]  ;;  %v451_v18 = vld [vmem:[%s3060_s16 + $0x78] sm:$0xff]  ;;  %v980_v32 = vmul.f32 0.0625, %v948_v23  ;;  %v870_v38 = vcvt.s32.f32 %v3147_v30  ;;  %v871_v39 = vcvt.s32.f32 %v3150_v31  ;;  %s2846_s20 = scalar_lea.vmem %s2845_s3, 1024 }
  0x2b   : > { %v696_v49 = vmul.f32 4.0, %v694_v42  ;;  %v704_v50 = vmul.f32 4.0, %v702_v43  ;;  %v705_v52 = vsub.f32 %v683_v22, %v703_v45  ;;  %v885_v22 = vcvt.s32.f32 %v855_v20 }
  0x2c   : > { %503 = vxpose.xlu0.b32.cont [4/16] (narrow) %v455_v25, 32  ;;  %v1012_v40 = vfloor.f32 %v980_v32 }
  0x2d   : > { %471 = vxpose.xlu1.b32.cont [4/16] (narrow) %v439_v26, 32  ;;  %v706_v53 = vsub.f32 %v684_v27, %v704_v50  ;;  %v707_v54 = vadd.f32 %v705_v52, %v695_v44  ;;  %v949_v25 = vadd.f32 0.5, %v885_v22  ;;  %v3135_v26 = vadd.s32 144, %v3073_v24 }
  0x2e   : > { %v3138_v27 = vadd.s32 152, %v3073_v24 }
  0x2f   : > { %v708_v57 = vadd.f32 %v706_v53, %v696_v49  ;;  %vm714_vm1 = vcmp.eq.f32.partialorder %v707_v54, %v3081_v46  ;;  %vm716_vm2 = vcmp.eq.f32.partialorder %v707_v54, %v3085_v51  ;;  %v981_v33 = vmul.f32 0.0625, %v949_v25 }
  0x30   : > { %504 = vxpose.xlu0.b32.cont [5/16] (narrow) %v456_v36, 32  ;;  %vm2704_vm5 = vmpackc.low %vm716_vm2, %vm714_vm1  ;;  %v886_v34 = vcvt.s32.f32 %v3135_v26  ;;  %v887_v35 = vcvt.s32.f32 %v3138_v27  ;;  %v964_v36 = vmul.f32 0.0625, %v3141_v28  ;;  %v1044_v49 = vmul.f32 16.0, %v1012_v40 }
  0x31   : > { %472 = vxpose.xlu1.b32.cont [5/16] (narrow) %v440_v37, 32  ;;  %vm715_vm3 = vcmp.eq.f32.partialorder %v708_v57, %v3081_v46  ;;  %vm717_vm4 = vcmp.eq.f32.partialorder %v708_v57, %v3085_v51  ;;  %v965_v37 = vmul.f32 0.0625, %v3144_v29  ;;  %v1013_v41 = vfloor.f32 %v981_v33 }
  0x32   : > { %vm2702_vm6 = vmpackc.low %vm717_vm4, %vm715_vm3  ;;  %v950_v42 = vadd.f32 0.5, %v886_v34  ;;  %v951_v43 = vadd.f32 0.5, %v887_v35  ;;  %v996_v44 = vfloor.f32 %v964_v36  ;;  %v533_v36 = vld [vmem:[%s3666_s1 + $0x8] sm:$0xff] }
  0x33   : > { %2703 = vmatprep.subr.msk.bf16.mxu0 %vm2702_vm6, %v2921_v58  ;;  %v997_v45 = vfloor.f32 %v965_v37  ;;  %v1045_v50 = vmul.f32 16.0, %v1013_v41 }
  0x34   : > { %505 = vxpose.xlu0.b32.cont [6/16] (narrow) %v457_v47, 32  ;;  %2705 = vmatpush1.bf16.msk.msra.mxu0 %vm2704_vm5, %v2921_v58  ;;  %v3164_v47 = vadd.f32 0.5, %v870_v38  ;;  %v982_v52 = vmul.f32 0.0625, %v950_v42  ;;  %v983_v53 = vmul.f32 0.0625, %v951_v43  ;;  %v1028_v54 = vmul.f32 16.0, %v996_v44 }
  0x35   : > { %473 = vxpose.xlu1.b32.cont [6/16] (narrow) %v441_v48, 32  ;;  %v3168_v48 = vadd.f32 0.5, %v871_v39 }
  0x36   : > { %v1015_v42 = vfloor.f32 %v983_v53 }
  0x37   : > { %2424 = vmatmul.mubr.msk.f32.vlgmr.msra.gmra.mrb[0].mxu0 %vm431_vm0, %v726_v61  ;;  %v3174_v57 = vmul.f32 0.0625, %v3168_v48  ;;  %v1108_v61 = vadd.f32 0.5, %v1012_v40 }
  0x38   : > { %506 = vxpose.xlu0.b32.cont [7/16] (narrow) %v458_v55, 32  ;;  %813 = vmatprep.mubr.f32.mxu0 %v2920_v1  ;;  %v1029_v55 = vmul.f32 16.0, %v997_v45  ;;  %v1111_v53 = vadd.f32 0.5, %v1015_v42 }
  0x39   : > { %474 = vxpose.xlu1.b32.cont [7/16] (narrow) %v442_v56, 32  ;;  %v3171_v56 = vmul.f32 0.0625, %v3164_v47 }
  0x3b   : > { %2425 = vmatmul.mubr.msk.f32.gmra.mrb[2].mxu0 %vm431_vm0, %v727_v0  ;;  %v1061_v0 = vsub.f32 %v3085_v51, %v1029_v55  ;;  %v1047_v55 = vmul.f32 16.0, %v1015_v42  ;;  %v535_v42 = vld [vmem:[%s3666_s1 + $0x18] sm:$0xff] }
  0x3c   : > { %507 = vxpose.xlu0.b32.cont [8/16] (narrow) %v459_v59, 32  ;;  %819 = vmatprep.mubr.f32.mxu0 %v2920_v1  ;;  %v1076_v59 = vsub.f32 %v884_v21, %v1044_v49  ;;  %v999_v49 = vfloor.f32 %v3174_v57 }
  0x3d   : > { %475 = vxpose.xlu1.b32.cont [8/16] (narrow) %v443_v60, 32  ;;  %v1077_v60 = vsub.f32 %v885_v22, %v1045_v50  ;;  %v2922_v50 = vmov 0  }
  0x3f   : > { %2426 = vmatmul.mubr.msk.f32.gmra.mrb[4].mxu0 %vm431_vm0, %v728_v5  ;;  %v1140_v5 = vmul.f32 0.25, %v1108_v61  ;;  %v1031_v61 = vmul.f32 16.0, %v999_v49 }
  0x40   : > { %508 = vxpose.xlu0.b32.cont [9/16] (narrow) %v460_v62, 32  ;;  %825 = vmatprep.mubr.f32.mxu0 %v2920_v1  ;;  %v465_v1 = vld [vmem:[%s3060_s16 + $0xe8] sm:$0xff]  ;;  %v1109_v62 = vadd.f32 0.5, %v1013_v41  ;;  %v1014_v41 = vfloor.f32 %v982_v52  ;;  %s401_s16 = sand.u32 1, %s2902_s18  }
  0x41   : > { %476 = vxpose.xlu1.b32.cont [9/16] (narrow) %v444_v63, 32  ;;  %v1060_v63 = vsub.f32 %v3081_v46, %v1028_v54  ;;  %v1063_v26 = vsub.f32 %v871_v39, %v1031_v61  ;;  %v3240_v61 = vadd.s32 48, %v3073_v24  ;;  %s2411_s24 = sshll.u32 %s401_s16, 5  ;;  %s3589_s14 = scalar_lea.sflag [#allocation4], %s401_s16 }
  0x42   : > { %v1046_v54 = vmul.f32 16.0, %v1014_v41  ;;  %v1110_v52 = vadd.f32 0.5, %v1014_v41  ;;  %s403_s26 = scalar_lea.vmem [#allocation3], %s2411_s24 }
  0x43   : > { %2427 = vmatmul.mubr.msk.f32.gmra.mrb[6].mxu0 %vm431_vm0, %v729_v9  ;;  %v1237_v9 = vadd.f32 0.5, %v1077_v60  ;;  %s2302_s28 = sshll.u32 %s403_s26, 4  ;;  %s3573_s28 = int_to_ptr.vmem [resolvable:$true] %s2302_s28 }
  0x44   : > { %509 = vxpose.xlu0.b32.cont [10/16] (narrow) %v461_v2, 32  ;;  %v1092_v2 = vadd.f32 0.5, %v996_v44  ;;  %v1078_v57 = vsub.f32 %v886_v34, %v1046_v54  ;;  %v3231_v54 = vadd.s32 176, %v3073_v24  ;;  %s2840_s13 = scalar_lea.vmem %s3573_s28, 512  ;;  %p2847_p1 = scmp.lt.s32.totalorder %s3573_s28, %s2845_s3 }
  0x45   : > { %477 = vxpose.xlu1.b32.cont [10/16] (narrow) %v445_v3, 32  ;;  %v1093_v3 = vadd.f32 0.5, %v997_v45  ;;  %v998_v45 = vfloor.f32 %v3171_v56  ;;  %v536_v56 = vld [vmem:[%s3667_s2] sm:$0xff]  ;;  %p2841_p12 = scmp.ne.s32.totalorder %s3573_s28, %s2840_s13  ;;  %p2848_p2 = scmp.lt.s32.totalorder %s2846_s20, %s2840_s13 }
  0x47   : > { %v1030_v60 = vmul.f32 16.0, %v998_v45  ;;  %p2842_p13 = pnand %p2841_p12, %p3026_p4  ;;  %p2849_p3 = por %p2848_p2, %p2847_p1 }
  0x48   : > { %510 = vxpose.xlu0.b32.cont [11/16] (narrow) %v462_v6, 32  ;;  %v1141_v6 = vmul.f32 0.25, %v1109_v62  ;;  %v1142_v62 = vmul.f32 0.25, %v1110_v52 }
  0x49   : > { %478 = vxpose.xlu1.b32.cont [11/16] (narrow) %v446_v7, 32  ;;  %v1236_v7 = vadd.f32 0.5, %v1076_v59  ;;  %v1079_v59 = vsub.f32 %v887_v35, %v1047_v55  ;;  %v3234_v55 = vadd.s32 184, %v3073_v24  ;;  %p2843_p0 = pneg %p2842_p13 }
  0x4a   : > { %v1174_v34 = vfloor.f32 %v1142_v62  ;;  %v3243_v62 = vadd.s32 56, %v3073_v24 }
  0x4b   : > { %p2850_p5 = pnand %p2849_p3, %p2843_p0 }
  0x4c   : > { %511 = vxpose.xlu0.b32.cont [12/16] (narrow) %v463_v10, 32  ;;  %v1124_v10 = vmul.f32 0.25, %v1092_v2  ;;  %v1095_v2 = vadd.f32 0.5, %v999_v49 }
  0x4d   : > { %479 = vxpose.xlu1.b32.cont [12/16] (narrow) %v447_v11, 32  ;;  %v1125_v11 = vmul.f32 0.25, %v1093_v3  ;;  %v1238_v3 = vadd.f32 0.5, %v1078_v57 }
  0x50   : > { %512 = vxpose.xlu0.b32.cont [13/16] (narrow) %v464_v12, 32  ;;  %v1220_v12 = vadd.f32 0.5, %v1060_v63  ;;  %v1143_v63 = vmul.f32 0.25, %v1111_v53 }
  0x51   : > { %480 = vxpose.xlu1.b32.cont [13/16] (narrow) %v448_v13, 32  ;;  %v1221_v13 = vadd.f32 0.5, %v1061_v0  ;;  %v1094_v0 = vadd.f32 0.5, %v998_v45 }
  0x52   : > { %v1252_v19 = vmul.f32 0.25, %v1220_v12  ;;  %v1175_v27 = vfloor.f32 %v1143_v63  ;;  %v539_v63 = vld [vmem:[%s3667_s2 + $0x18] sm:$0xff] }
  0x53   : > { %v1253_v46 = vmul.f32 0.25, %v1221_v13  ;;  %v1126_v35 = vmul.f32 0.25, %v1094_v0  ;;  %v1223_v13 = vadd.f32 0.5, %v1063_v26 }
  0x54   : > { %513 = vxpose.xlu0.b32.cont [14/16] (narrow) %v465_v1, 32  ;;  %v1172_v1 = vfloor.f32 %v1140_v5  ;;  %v1284_v32 = vfloor.f32 %v1252_v19  ;;  %v1239_v5 = vadd.f32 0.5, %v1079_v59  ;;  %v890_v59 = vcvt.s32.f32 %v3231_v54 }
  0x55   : > { %481 = vxpose.xlu1.b32.cont [14/16] (narrow) %v449_v14, 32  ;;  %v1173_v14 = vfloor.f32 %v1141_v6  ;;  %v1285_v33 = vfloor.f32 %v1253_v46  ;;  %v1062_v6 = vsub.f32 %v870_v38, %v1030_v60  ;;  %v1158_v30 = vfloor.f32 %v1126_v35 }
  0x56   : > { %v1204_v20 = vmul.f32 4.0, %v1172_v1  ;;  %v1206_v1 = vmul.f32 4.0, %v1174_v34  ;;  %v858_v46 = vadd.s32 160, %v3073_v24  ;;  %v891_v60 = vcvt.s32.f32 %v3234_v55 }
  0x57   : > { %v1205_v51 = vmul.f32 4.0, %v1173_v14  ;;  %v1222_v12 = vadd.f32 0.5, %v1062_v6  ;;  %v1207_v14 = vmul.f32 4.0, %v1175_v27  ;;  %v954_v6 = vadd.f32 0.5, %v890_v59 }
  0x58   : > { %514 = vxpose.xlu0.b32.cont [15/16] (narrow) %v466_v15, 32  ;;  %v1268_v15 = vmul.f32 0.25, %v1236_v7  ;;  %v1127_v7 = vmul.f32 0.25, %v1095_v2  ;;  %v955_v26 = vadd.f32 0.5, %v891_v60  ;;  %v874_v34 = vcvt.s32.f32 %v3240_v61 }
  0x59   : > { %482 = vxpose.xlu1.b32.cont [15/16] (narrow) %v450_v16, 32  ;;  %v1269_v16 = vmul.f32 0.25, %v1237_v9  ;;  %v537_v9 = vld [vmem:[%s3667_s2 + $0x8] sm:$0xff]  ;;  %v1254_v39 = vmul.f32 0.25, %v1222_v12  ;;  %v875_v27 = vcvt.s32.f32 %v3243_v62 }
  0x5a   : > { %v1300_v21 = vfloor.f32 %v1268_v15  ;;  %v1159_v38 = vfloor.f32 %v1127_v7 }
  0x5b   : > { %v1301_v22 = vfloor.f32 %v1269_v16  ;;  %v1255_v16 = vmul.f32 0.25, %v1223_v13  ;;  %v986_v13 = vmul.f32 0.0625, %v954_v6 }
  0x5c   : > { %515 = vxpose.xlu0.b32.end [16/16] (narrow) %v467_v17, 32  ;;  %v1156_v17 = vfloor.f32 %v1124_v10  ;;  %v1332_v37 = vadd.f32 %v1300_v21, %v1204_v20  ;;  %v1270_v10 = vmul.f32 0.25, %v1238_v3  ;;  %v1191_v19 = vmul.f32 4.0, %v1159_v38 }
  0x5d   : > { %483 = vxpose.xlu1.b32.end [16/16] (narrow) %v451_v18, 32  ;;  %v1157_v18 = vfloor.f32 %v1125_v11  ;;  %v1333_v40 = vadd.f32 %v1301_v22, %v1205_v51  ;;  %v1271_v11 = vmul.f32 0.25, %v1239_v5  ;;  %v859_v20 = vadd.s32 168, %v3073_v24  ;;  %v534_v51 = vld [vmem:[%s3666_s1 + $0x10] sm:$0xff] }
  0x5e   : > { %v1188_v23 = vmul.f32 4.0, %v1156_v17  ;;  %vm1364_vm7 = vcmp.eq.f32.partialorder %v1332_v37, %v3055_v4  ;;  %v1302_v15 = vfloor.f32 %v1270_v10  ;;  %v532_v17 = vld [vmem:[%s3666_s1] sm:$0xff]  ;;  %v3215_v37 = vadd.s32 40, %v3073_v24 }
  0x5f   : > { %v1189_v25 = vmul.f32 4.0, %v1157_v18  ;;  %vm1365_vm8 = vcmp.eq.f32.partialorder %v1333_v40, %v3055_v4  ;;  %v1303_v31 = vfloor.f32 %v1271_v11  ;;  %v1190_v18 = vmul.f32 4.0, %v1158_v30 }
  0x60   : > { %v1316_v43 = vadd.f32 %v1284_v32, %v1188_v23  ;;  %vm2476_vm9 = vmpackc.low %vm1365_vm8, %vm1364_vm7  ;;  %v1334_v21 = vadd.f32 %v1302_v15, %v1206_v1  ;;  %v1286_v23 = vfloor.f32 %v1254_v39  ;;  %v888_v32 = vcvt.s32.f32 %v858_v46 }
  0x61   : > { %v1317_v44 = vadd.f32 %v1285_v33, %v1189_v25  ;;  %2532 = vmatprep.subr.msk.bf16.mxu1 %vm2476_vm9, %v2921_v58  ;;  %v1335_v22 = vadd.f32 %v1303_v31, %v1207_v14  ;;  %v1287_v25 = vfloor.f32 %v1255_v16  ;;  %v889_v33 = vcvt.s32.f32 %v859_v20 }
  0x62   : > { %vm1348_vm10 = vcmp.eq.f32.partialorder %v1316_v43, %v3055_v4  ;;  %vm1366_vm13 = vcmp.eq.f32.partialorder %v1334_v21, %v3055_v4  ;;  %v1318_v40 = vadd.f32 %v1286_v23, %v1190_v18  ;;  %v952_v43 = vadd.f32 0.5, %v888_v32 }
  0x63   : > { %vm1349_vm11 = vcmp.eq.f32.partialorder %v1317_v44, %v3055_v4  ;;  %vm1367_vm14 = vcmp.eq.f32.partialorder %v1335_v22, %v3055_v4  ;;  %v1319_v41 = vadd.f32 %v1287_v25, %v1191_v19  ;;  %v953_v44 = vadd.f32 0.5, %v889_v33 }
  0x64   : > { %vm2460_vm12 = vmpackc.low %vm1349_vm11, %vm1348_vm10  ;;  %v873_v49 = vcvt.s32.f32 %v3215_v37  ;;  %vm1350_vm1 = vcmp.eq.f32.partialorder %v1318_v40, %v3055_v4  ;;  %v984_v52 = vmul.f32 0.0625, %v952_v43  ;;  %v987_v1 = vmul.f32 0.0625, %v955_v26 }
  0x65   : > { %2533 = vmatpush3.bf16.msk.msra.mxu1 %vm2460_vm12, %v2921_v58  ;;  %vm2478_vm15 = vmpackc.low %vm1367_vm14, %vm1366_vm13  ;;  %vm1351_vm2 = vcmp.eq.f32.partialorder %v1319_v41, %v3055_v4  ;;  %v985_v53 = vmul.f32 0.0625, %v953_v44 }
  0x66   : > { %2534 = vmatprep.subr.msk.bf16.mxu1 %vm2478_vm15, %v2921_v58  ;;  %vm2462_vm3 = vmpackc.low %vm1351_vm2, %vm1350_vm1  ;;  %v937_v57 = vadd.f32 0.5, %v873_v49  ;;  %v1016_v0 = vfloor.f32 %v984_v52  ;;  %v1019_v52 = vfloor.f32 %v987_v1 }
  0x67   : > { %v1017_v2 = vfloor.f32 %v985_v53 }
  0x68   : > { %v969_v5 = vmul.f32 0.0625, %v937_v57  ;;  %v1048_v35 = vmul.f32 16.0, %v1016_v0  ;;  %v1115_v26 = vadd.f32 0.5, %v1019_v52 }
  0x69   : > { %2535 = vmatpush3.bf16.msk.msra.mxu1 %vm2462_vm3, %v2921_v58  ;;  %v1049_v7 = vmul.f32 16.0, %v1017_v2  ;;  %v1113_v10 = vadd.f32 0.5, %v1017_v2  ;;  %v1051_v2 = vmul.f32 16.0, %v1019_v52 }
  0x6a   : > { %v1001_v12 = vfloor.f32 %v969_v5  ;;  %v1080_v14 = vsub.f32 %v888_v32, %v1048_v35 }
  0x6b   : > { %v1081_v30 = vsub.f32 %v889_v33, %v1049_v7  ;;  %v1145_v15 = vmul.f32 0.25, %v1113_v10  ;;  %v1083_v7 = vsub.f32 %v891_v60, %v1051_v2 }
  0x6c   : > { %v1033_v39 = vmul.f32 16.0, %v1001_v12  ;;  %v1240_v46 = vadd.f32 0.5, %v1080_v14  ;;  %v938_v14 = vadd.f32 0.5, %v874_v34 }
  0x6d   : > { %v1177_v19 = vfloor.f32 %v1145_v15  ;;  %v1241_v20 = vadd.f32 0.5, %v1081_v30  ;;  %v1243_v1 = vadd.f32 0.5, %v1083_v7  ;;  %v939_v30 = vadd.f32 0.5, %v875_v27 }
  0x6e   : > { %v1065_v21 = vsub.f32 %v873_v49, %v1033_v39  ;;  %v1272_v37 = vmul.f32 0.25, %v1240_v46 }
  0x6f   : > { %v1273_v40 = vmul.f32 0.25, %v1241_v20  ;;  %v1275_v60 = vmul.f32 0.25, %v1243_v1  ;;  %v971_v15 = vmul.f32 0.0625, %v939_v30 }
  0x70   : > { %v1304_v43 = vfloor.f32 %v1272_v37 }
  0x71   : > { %v1305_v44 = vfloor.f32 %v1273_v40  ;;  %v1003_v20 = vfloor.f32 %v971_v15 }
  0x7b   : > { %2819 = vset.pattern.permute.xlu1 %v2922_v50 }
  0x7c   : > { %616 = vperm.xlu1 %2819, %v533_v36   ;;  %v3212_v36 = vadd.s32 32, %v3073_v24 }
  0x7e   : > { %v872_v45 = vcvt.s32.f32 %v3212_v36  ;;  %v1209_v36 = vmul.f32 4.0, %v1177_v19  ;;  %v1307_v19 = vfloor.f32 %v1275_v60 }
  0x80   : > { %639 = vperm.xlu1 %2819, %v536_v56   ;;  %v936_v56 = vadd.f32 0.5, %v872_v45  ;;  %v1337_v49 = vadd.f32 %v1305_v44, %v1209_v36  ;;  %v3278_v36 = vadd.s32 72, %v3073_v24 }
  0x82   : > { %v968_v3 = vmul.f32 0.0625, %v936_v56  ;;  %vm1369_vm5 = vcmp.eq.f32.partialorder %v1337_v49, %v3055_v4  ;;  %v877_v7 = vcvt.s32.f32 %v3278_v36 }
  0x84   : > { %644 = vperm.xlu1 %2819, %v537_v9   ;;  %v1112_v9 = vadd.f32 0.5, %v1016_v0  ;;  %v1000_v11 = vfloor.f32 %v968_v3 }
  0x85   : > { %2818 = vset.pattern.permute.xlu0 %v2922_v50  ;;  %v538_v50 = vld [vmem:[%s3667_s2 + $0x10] sm:$0xff] }
  0x86   : > { %611 = vperm.xlu0 %2818, %v532_v17   ;;  %v1144_v38 = vmul.f32 0.25, %v1112_v9  ;;  %v1032_v31 = vmul.f32 16.0, %v1000_v11  ;;  %v1096_v16 = vadd.f32 0.5, %v1000_v11  ;;  %v1097_v17 = vadd.f32 0.5, %v1001_v12 }
  0x87   : > { %v1147_v12 = vmul.f32 0.25, %v1115_v26 }
  0x88   : > { %621 = vperm.xlu1 %2819, %v534_v51   ;;  %v1176_v18 = vfloor.f32 %v1144_v38  ;;  %v1064_v51 = vsub.f32 %v872_v45, %v1032_v31  ;;  %v1128_v22 = vmul.f32 0.25, %v1096_v16  ;;  %v1129_v23 = vmul.f32 0.25, %v1097_v17 }
  0x89   : > { %v1179_v55 = vfloor.f32 %v1147_v12  ;;  %v970_v38 = vmul.f32 0.0625, %v938_v14  ;;  %v862_v16 = vadd.s32 192, %v3073_v24  ;;  %v863_v17 = vadd.s32 200, %v3073_v24 }
  0x8a   : > { %626 = vperm.xlu0 %2818, %v535_v42   ;;  %v1208_v25 = vmul.f32 4.0, %v1176_v18  ;;  %v1160_v32 = vfloor.f32 %v1128_v22  ;;  %v1161_v33 = vfloor.f32 %v1129_v23  ;;  %v1224_v41 = vadd.f32 0.5, %v1064_v51 }
  0x8b   : > { %v1225_v42 = vadd.f32 0.5, %v1065_v21  ;;  %v1211_v39 = vmul.f32 4.0, %v1179_v55  ;;  %v1002_v46 = vfloor.f32 %v970_v38  ;;  %v892_v22 = vcvt.s32.f32 %v862_v16 }
  0x8c   : > { %649 = vperm.xlu1 %2819, %v538_v50   ;;  %v1018_v50 = vfloor.f32 %v986_v13  ;;  %v1192_v53 = vmul.f32 4.0, %v1160_v32  ;;  %v1193_v56 = vmul.f32 4.0, %v1161_v33  ;;  %v1256_v57 = vmul.f32 0.25, %v1224_v41 }
  0x8d   : > { %v1336_v45 = vadd.f32 %v1304_v43, %v1208_v25  ;;  %v893_v23 = vcvt.s32.f32 %v863_v17  ;;  %v3275_v25 = vadd.s32 64, %v3073_v24  ;;  %v1339_v40 = vadd.f32 %v1307_v19, %v1211_v39 }
  0x8e   : > { %654 = vperm.xlu0 %2818, %v539_v63   ;;  %v1257_v63 = vmul.f32 0.25, %v1225_v42  ;;  %v1050_v0 = vmul.f32 16.0, %v1018_v50  ;;  %v1288_v3 = vfloor.f32 %v1256_v57  ;;  %v1114_v6 = vadd.f32 0.5, %v1018_v50 }
  0x8f   : > { %vm1368_vm4 = vcmp.eq.f32.partialorder %v1336_v45, %v3055_v4  ;;  %v1034_v32 = vmul.f32 16.0, %v1002_v46  ;;  %v1035_v33 = vmul.f32 16.0, %v1003_v20  ;;  %v1098_v41 = vadd.f32 0.5, %v1002_v46 }
  0x90   : > { %v1289_v5 = vfloor.f32 %v1257_v63  ;;  %v1082_v35 = vsub.f32 %v890_v59, %v1050_v0  ;;  %vm2480_vm6 = vmpackc.low %vm1369_vm5, %vm1368_vm4  ;;  %v1320_v9 = vadd.f32 %v1288_v3, %v1192_v53  ;;  %v1146_v11 = vmul.f32 0.25, %v1114_v6 }
  0x91   : > { %2536 = vmatprep.subr.msk.bf16.mxu1 %vm2480_vm6, %v2921_v58  ;;  %v1099_v42 = vadd.f32 0.5, %v1003_v20  ;;  %v956_v43 = vadd.f32 0.5, %v892_v22  ;;  %v957_v44 = vadd.f32 0.5, %v893_v23  ;;  %vm1371_vm11 = vcmp.eq.f32.partialorder %v1339_v40, %v3055_v4 }
  0x92   : > { %v1321_v10 = vadd.f32 %v1289_v5, %v1193_v56  ;;  %v1242_v13 = vadd.f32 0.5, %v1082_v35  ;;  %vm1352_vm7 = vcmp.eq.f32.partialorder %v1320_v9, %v3055_v4  ;;  %v1178_v54 = vfloor.f32 %v1146_v11 }
  0x93   : > { %v1066_v50 = vsub.f32 %v874_v34, %v1034_v32  ;;  %v1067_v52 = vsub.f32 %v875_v27, %v1035_v33  ;;  %v1130_v57 = vmul.f32 0.25, %v1098_v41  ;;  %v1131_v63 = vmul.f32 0.25, %v1099_v42 }
  0x94   : > { %vm1353_vm8 = vcmp.eq.f32.partialorder %v1321_v10, %v3055_v4  ;;  %v1274_v59 = vmul.f32 0.25, %v1242_v13  ;;  %v1210_v31 = vmul.f32 4.0, %v1178_v54  ;;  %v988_v45 = vmul.f32 0.0625, %v956_v43 }
  0x95   : > { %vm2464_vm9 = vmpackc.low %vm1353_vm8, %vm1352_vm7  ;;  %v989_v49 = vmul.f32 0.0625, %v957_v44  ;;  %v1226_v61 = vadd.f32 0.5, %v1066_v50  ;;  %v1227_v62 = vadd.f32 0.5, %v1067_v52  ;;  %v1162_v34 = vfloor.f32 %v1130_v57 }
  0x96   : > { %2537 = vmatpush3.bf16.msk.msra.mxu1 %vm2464_vm9, %v2921_v58  ;;  %v1306_v18 = vfloor.f32 %v1274_v59  ;;  %v1163_v27 = vfloor.f32 %v1131_v63  ;;  %v1020_v3 = vfloor.f32 %v988_v45  ;;  %v876_v35 = vcvt.s32.f32 %v3275_v25 }
  0x97   : > { %v1021_v5 = vfloor.f32 %v989_v49  ;;  %v1258_v6 = vmul.f32 0.25, %v1226_v61  ;;  %v1259_v26 = vmul.f32 0.25, %v1227_v62  ;;  %v1194_v11 = vmul.f32 4.0, %v1162_v34 }
  0x98   : > { %v1338_v37 = vadd.f32 %v1306_v18, %v1210_v31  ;;  %v1195_v12 = vmul.f32 4.0, %v1163_v27  ;;  %v1052_v13 = vmul.f32 16.0, %v1020_v3  ;;  %v1116_v38 = vadd.f32 0.5, %v1020_v3 }
  0x99   : > { %v1053_v1 = vmul.f32 16.0, %v1021_v5  ;;  %v1290_v54 = vfloor.f32 %v1258_v6  ;;  %v1291_v55 = vfloor.f32 %v1259_v26  ;;  %v1117_v15 = vadd.f32 0.5, %v1021_v5 }
  0x9a   : > { %vm1370_vm10 = vcmp.eq.f32.partialorder %v1338_v37, %v3055_v4  ;;  %v1084_v59 = vsub.f32 %v892_v22, %v1052_v13  ;;  %v940_v16 = vadd.f32 0.5, %v876_v35  ;;  %v941_v17 = vadd.f32 0.5, %v877_v7 }
  0x9b   : > { %vm2482_vm12 = vmpackc.low %vm1371_vm11, %vm1370_vm10  ;;  %v1085_v60 = vsub.f32 %v893_v23, %v1053_v1  ;;  %v1322_v31 = vadd.f32 %v1290_v54, %v1194_v11  ;;  %v1323_v39 = vadd.f32 %v1291_v55, %v1195_v12  ;;  %v1148_v46 = vmul.f32 0.25, %v1116_v38 }
  0x9c   : > { %2538 = vmatprep.subr.msk.bf16.mxu1 %vm2482_vm12, %v2921_v58  ;;  %v1149_v20 = vmul.f32 0.25, %v1117_v15  ;;  %v1244_v37 = vadd.f32 0.5, %v1084_v59  ;;  %v972_v50 = vmul.f32 0.0625, %v940_v16  ;;  %v973_v52 = vmul.f32 0.0625, %v941_v17 }
  0x9d   : > { %v1245_v40 = vadd.f32 0.5, %v1085_v60  ;;  %vm1354_vm13 = vcmp.eq.f32.partialorder %v1322_v31, %v3055_v4  ;;  %vm1355_vm14 = vcmp.eq.f32.partialorder %v1323_v39, %v3055_v4  ;;  %v1180_v32 = vfloor.f32 %v1148_v46 }
  0x9e   : > { %vm2466_vm15 = vmpackc.low %vm1355_vm14, %vm1354_vm13  ;;  %v1181_v33 = vfloor.f32 %v1149_v20  ;;  %v1276_v41 = vmul.f32 0.25, %v1244_v37  ;;  %v1004_v61 = vfloor.f32 %v972_v50  ;;  %v1005_v62 = vfloor.f32 %v973_v52 }
  0x9f   : > { %v1277_v42 = vmul.f32 0.25, %v1245_v40  ;;  %2539 = vmatpush3.bf16.msk.msra.mxu1 %vm2466_vm15, %v2921_v58  ;;  %v1212_v57 = vmul.f32 4.0, %v1180_v32  ;;  %v3317_v3 = vadd.s32 208, %v3073_v24  ;;  %v3320_v5 = vadd.s32 216, %v3073_v24 }
  0xa0   : > { %v3270_v51 = vpop.trf.xlu0  ;;  %v1213_v63 = vmul.f32 4.0, %v1181_v33  ;;  %v1308_v45 = vfloor.f32 %v1276_v41  ;;  %v1036_v11 = vmul.f32 16.0, %v1004_v61  ;;  %v1037_v12 = vmul.f32 16.0, %v1005_v62 }
  0xa1   : > { %v3272_v21 = vpop.trf.xlu1  ;;  %v1309_v49 = vfloor.f32 %v1277_v42  ;;  %v1100_v13 = vadd.f32 0.5, %v1004_v61  ;;  %v1101_v1 = vadd.f32 0.5, %v1005_v62  ;;  %v894_v38 = vcvt.s32.f32 %v3317_v3 }
  0xa2   : > { %v1340_v34 = vadd.f32 %v1308_v45, %v1212_v57  ;;  %v1068_v54 = vsub.f32 %v876_v35, %v1036_v11  ;;  %v1069_v55 = vsub.f32 %v877_v7, %v1037_v12  ;;  %v895_v15 = vcvt.s32.f32 %v3320_v5 }
  0xa3   : > { %v1341_v27 = vadd.f32 %v1309_v49, %v1213_v63  ;;  %v1132_v59 = vmul.f32 0.25, %v1100_v13  ;;  %v1133_v60 = vmul.f32 0.25, %v1101_v1  ;;  %v958_v37 = vadd.f32 0.5, %v894_v38 }
  0xa4   : > { %v3286_v53 = vpop.trf.xlu0  ;;  %vm1372_vm1 = vcmp.eq.f32.partialorder %v1340_v34, %v3055_v4  ;;  %v1228_v16 = vadd.f32 0.5, %v1068_v54  ;;  %v1229_v17 = vadd.f32 0.5, %v1069_v55  ;;  %v959_v25 = vadd.f32 0.5, %v895_v15 }
  0xa5   : > { %v3288_v56 = vpop.trf.xlu1  ;;  %v549_v0 = vadd.f32 %v3286_v53, %v3270_v51  ;;  %vm1373_vm2 = vcmp.eq.f32.partialorder %v1341_v27, %v3055_v4  ;;  %v1164_v46 = vfloor.f32 %v1132_v59  ;;  %v1165_v20 = vfloor.f32 %v1133_v60 }
  0xa6   : > { %v540_v2 = vadd.f32 %v3288_v56, %v3272_v21  ;;  %vm2484_vm3 = vmpackc.low %vm1373_vm2, %vm1372_vm1  ;;  %v1260_v36 = vmul.f32 0.25, %v1228_v16  ;;  %v1261_v7 = vmul.f32 0.25, %v1229_v17  ;;  %v3357_v61 = vadd.s32 88, %v3073_v24 }
  0xa7   : > { %2540 = vmatprep.subr.msk.bf16.mxu1 %vm2484_vm3, %v2921_v58  ;;  %v1196_v41 = vmul.f32 4.0, %v1164_v46  ;;  %v1197_v42 = vmul.f32 4.0, %v1165_v20 }
  0xa8   : > { %v3297_v9 = vpop.trf.xlu0  ;;  %v879_v60 = vcvt.s32.f32 %v3357_v61 }
  0xa9   : > { %v3299_v10 = vpop.trf.xlu1  ;;  %v550_v14 = vadd.f32 %v549_v0, %v3297_v9 }
  0xaa   : > { %v541_v30 = vadd.f32 %v540_v2, %v3299_v10  ;;  %v943_v20 = vadd.f32 0.5, %v879_v60 }
  0xac   : > { %v3307_v18 = vpop.trf.xlu0 }
  0xad   : > { %v3309_v19 = vpop.trf.xlu1  ;;  %v551_v22 = vadd.f32 %v550_v14, %v3307_v18 }
  0xae   : > { %v542_v23 = vadd.f32 %v541_v30, %v3309_v19 }
  0xaf   : > { %v552_v43 = vrot.slane %v551_v22, 4 }
  0xb0   : > { %v543_v44 = vrot.slane %v542_v23, 4 }
  0xb1   : > { %v553_v0 = vadd.f32 %v552_v43, %v551_v22  ;;  %v990_v22 = vmul.f32 0.0625, %v958_v37  ;;  %v1292_v43 = vfloor.f32 %v1260_v36 }
  0xb2   : > { %v544_v2 = vadd.f32 %v543_v44, %v542_v23  ;;  %v991_v23 = vmul.f32 0.0625, %v959_v25  ;;  %v1293_v44 = vfloor.f32 %v1261_v7 }
  0xb3   : > { %v554_v6 = vrot.slane %v553_v0, 2  ;;  %v1022_v63 = vfloor.f32 %v990_v22  ;;  %v1324_v27 = vadd.f32 %v1292_v43, %v1196_v41  ;;  %v975_v22 = vmul.f32 0.0625, %v943_v20 }
  0xb4   : > { %v545_v26 = vrot.slane %v544_v2, 2  ;;  %v1325_v3 = vadd.f32 %v1293_v44, %v1197_v42 }
  0xb5   : > { %v555_v14 = vadd.f32 %v554_v6, %v553_v0  ;;  %v1054_v5 = vmul.f32 16.0, %v1022_v63  ;;  %vm1356_vm4 = vcmp.eq.f32.partialorder %v1324_v27, %v3055_v4  ;;  %v1007_v44 = vfloor.f32 %v975_v22 }
  0xb6   : > { %v546_v30 = vadd.f32 %v545_v26, %v544_v2  ;;  %v1023_v2 = vfloor.f32 %v991_v23  ;;  %v1118_v26 = vadd.f32 0.5, %v1022_v63  ;;  %vm1357_vm5 = vcmp.eq.f32.partialorder %v1325_v3, %v3055_v4 }
  0xb7   : > { %v556_v31 = vrot.slane %v555_v14, 1  ;;  %v1086_v12 = vsub.f32 %v894_v38, %v1054_v5  ;;  %vm2468_vm6 = vmpackc.low %vm1357_vm5, %vm1356_vm4  ;;  %v1039_v61 = vmul.f32 16.0, %v1007_v44 }
  0xb8   : > { %v547_v39 = vrot.slane %v546_v30, 1  ;;  %v1119_v11 = vadd.f32 0.5, %v1023_v2  ;;  %2541 = vmatpush3.bf16.msk.msra.mxu1 %vm2468_vm6, %v2921_v58 }
  0xb9   : > { %v557_v35 = vadd.f32 %v556_v31, %v555_v14  ;;  %v1150_v14 = vmul.f32 0.25, %v1118_v26  ;;  %v1246_v55 = vadd.f32 0.5, %v1086_v12  ;;  %v1071_v3 = vsub.f32 %v879_v60, %v1039_v61 }
  0xba   : > { %v548_v40 = vadd.f32 %v547_v39, %v546_v30  ;;  %v1151_v30 = vmul.f32 0.25, %v1119_v11  ;;  %v869_v61 = vadd.s32 248, %v3073_v24 }
  0xbb   : > { %v560_v32 = vmul.f32 0.03125, %v557_v35  ;;  %v1182_v39 = vfloor.f32 %v1150_v14  ;;  %v1231_v12 = vadd.f32 0.5, %v1071_v3 }
  0xbc   : > { %v559_v33 = vmul.f32 0.03125, %v548_v40  ;;  %v1183_v38 = vfloor.f32 %v1151_v30 }
  0xbd   : > { %v3332_v50 = vsub.f32 %v3270_v51, %v560_v32  ;;  %v3335_v52 = vsub.f32 %v3286_v53, %v560_v32  ;;  %v3338_v57 = vsub.f32 %v3297_v9, %v560_v32  ;;  %v3354_v9 = vadd.s32 80, %v3073_v24 }
  0xbe   : > { %v3341_v45 = vsub.f32 %v3272_v21, %v559_v33  ;;  %v3344_v49 = vsub.f32 %v3288_v56, %v559_v33  ;;  %v3347_v0 = vsub.f32 %v3299_v10, %v559_v33  ;;  %v3360_v21 = vsub.f32 %v3307_v18, %v560_v32 }
  0xbf   : > { %v570_v51 = vmul.f32 %v3332_v50, %v3332_v50  ;;  %v572_v53 = vmul.f32 %v3335_v52, %v3335_v52  ;;  %v3363_v56 = vsub.f32 %v3309_v19, %v559_v33  ;;  %v574_v34 = vmul.f32 %v3338_v57, %v3338_v57 }
  0xc0   : > { %v569_v10 = vmul.f32 %v3341_v45, %v3341_v45  ;;  %v571_v62 = vmul.f32 %v3344_v49, %v3344_v49  ;;  %v573_v6 = vmul.f32 %v3347_v0, %v3347_v0  ;;  %v1055_v18 = vmul.f32 16.0, %v1023_v2 }
  0xc1   : > { %v586_v19 = vadd.f32 %v572_v53, %v570_v51  ;;  %v576_v54 = vmul.f32 %v3360_v21, %v3360_v21  ;;  %v878_v59 = vcvt.s32.f32 %v3354_v9  ;;  %v575_v31 = vmul.f32 %v3363_v56, %v3363_v56 }
  0xc2   : > { %v577_v13 = vadd.f32 %v571_v62, %v569_v10  ;;  %v1087_v1 = vsub.f32 %v895_v15, %v1055_v18  ;;  %v1278_v15 = vmul.f32 0.25, %v1246_v55  ;;  %v1214_v25 = vmul.f32 4.0, %v1182_v39 }
  0xc3   : > { %v587_v17 = vadd.f32 %v586_v19, %v574_v34  ;;  %v942_v46 = vadd.f32 0.5, %v878_v59  ;;  %v1215_v35 = vmul.f32 4.0, %v1183_v38  ;;  %v866_v32 = vadd.s32 224, %v3073_v24 }
  0xc4   : > { %v1247_v16 = vadd.f32 0.5, %v1087_v1  ;;  %v578_v37 = vadd.f32 %v577_v13, %v573_v6  ;;  %v1310_v36 = vfloor.f32 %v1278_v15  ;;  %v867_v33 = vadd.s32 232, %v3073_v24 }
  0xc5   : > { %v974_v7 = vmul.f32 0.0625, %v942_v46  ;;  %v588_v41 = vadd.f32 %v587_v17, %v576_v54  ;;  %v896_v51 = vcvt.s32.f32 %v866_v32  ;;  %v1103_v62 = vadd.f32 0.5, %v1007_v44 }
  0xc6   : > { %v1279_v40 = vmul.f32 0.25, %v1247_v16  ;;  %v1342_v42 = vadd.f32 %v1310_v36, %v1214_v25  ;;  %v579_v63 = vadd.f32 %v578_v37, %v575_v31  ;;  %v897_v53 = vcvt.s32.f32 %v867_v33 }
  0xc7   : > { %v1006_v43 = vfloor.f32 %v974_v7  ;;  %v589_v34 = vrot.slane %v588_v41, 4  ;;  %v960_v5 = vadd.f32 0.5, %v896_v51  ;;  %v1135_v26 = vmul.f32 0.25, %v1103_v62 }
  0xc8   : > { %v1311_v23 = vfloor.f32 %v1279_v40  ;;  %vm1374_vm7 = vcmp.eq.f32.partialorder %v1342_v42, %v3055_v4  ;;  %v580_v6 = vrot.slane %v579_v63, 4  ;;  %v961_v11 = vadd.f32 0.5, %v897_v53 }
  0xc9   : > { %v1038_v9 = vmul.f32 16.0, %v1006_v43  ;;  %v1102_v10 = vadd.f32 0.5, %v1006_v43  ;;  %v992_v13 = vmul.f32 0.0625, %v960_v5  ;;  %v1167_v14 = vfloor.f32 %v1135_v26 }
  0xca   : > { %v1343_v2 = vadd.f32 %v1311_v23, %v1215_v35  ;;  %v993_v30 = vmul.f32 0.0625, %v961_v11  ;;  %v590_v54 = vadd.f32 %v589_v34, %v588_v41  ;;  %v1263_v31 = vmul.f32 0.25, %v1231_v12 }
  0xcb   : > { %v1070_v27 = vsub.f32 %v878_v59, %v1038_v9  ;;  %v1134_v18 = vmul.f32 0.25, %v1102_v10  ;;  %v1024_v39 = vfloor.f32 %v992_v13  ;;  %v581_v38 = vadd.f32 %v580_v6, %v579_v63 }
  0xcc   : > { %vm1375_vm8 = vcmp.eq.f32.partialorder %v1343_v2, %v3055_v4  ;;  %v1199_v60 = vmul.f32 4.0, %v1167_v14  ;;  %v1025_v16 = vfloor.f32 %v993_v30  ;;  %v1295_v15 = vfloor.f32 %v1263_v31 }
  0xcd   : > { %vm2486_vm9 = vmpackc.low %vm1375_vm8, %vm1374_vm7  ;;  %v1230_v19 = vadd.f32 0.5, %v1070_v27  ;;  %v1166_v1 = vfloor.f32 %v1134_v18  ;;  %v1056_v46 = vmul.f32 16.0, %v1024_v39  ;;  %v1120_v37 = vadd.f32 0.5, %v1024_v39 }
  0xce   : > { %2542 = vmatprep.subr.msk.bf16.mxu1 %vm2486_vm9, %v2921_v58  ;;  %v1057_v20 = vmul.f32 16.0, %v1025_v16  ;;  %v1121_v25 = vadd.f32 0.5, %v1025_v16  ;;  %v591_v35 = vrot.slane %v590_v54, 2  ;;  %v1327_v36 = vadd.f32 %v1295_v15, %v1199_v60 }
  0xcf   : > { %v1262_v55 = vmul.f32 0.25, %v1230_v19  ;;  %v1198_v59 = vmul.f32 4.0, %v1166_v1  ;;  %v1088_v7 = vsub.f32 %v896_v51, %v1056_v46  ;;  %v582_v22 = vrot.slane %v581_v38, 2 }
  0xd0   : > { %v1089_v23 = vsub.f32 %v897_v53, %v1057_v20  ;;  %v1152_v32 = vmul.f32 0.25, %v1120_v37  ;;  %v1153_v33 = vmul.f32 0.25, %v1121_v25  ;;  %vm1359_vm11 = vcmp.eq.f32.partialorder %v1327_v36, %v3055_v4 }
  0xd1   : > { %v1294_v17 = vfloor.f32 %v1262_v55  ;;  %v1248_v41 = vadd.f32 0.5, %v1088_v7  ;;  %v850_v42 = vadd.s32 96, %v3073_v24  ;;  %v851_v2 = vadd.s32 104, %v3073_v24 }
  0xd2   : > { %v1184_v43 = vfloor.f32 %v1152_v32  ;;  %v1185_v44 = vfloor.f32 %v1153_v33  ;;  %v1249_v63 = vadd.f32 0.5, %v1089_v23  ;;  %v868_v53 = vadd.s32 240, %v3073_v24 }
  0xd3   : > { %v1326_v40 = vadd.f32 %v1294_v17, %v1198_v59  ;;  %v1280_v51 = vmul.f32 0.25, %v1248_v41  ;;  %v880_v9 = vcvt.s32.f32 %v850_v42  ;;  %v881_v27 = vcvt.s32.f32 %v851_v2 }
  0xd4   : > { %v1216_v10 = vmul.f32 4.0, %v1184_v43  ;;  %v1217_v62 = vmul.f32 4.0, %v1185_v44  ;;  %v1281_v34 = vmul.f32 0.25, %v1249_v63  ;;  %v898_v6 = vcvt.s32.f32 %v868_v53 }
  0xd5   : > { %vm1358_vm10 = vcmp.eq.f32.partialorder %v1326_v40, %v3055_v4  ;;  %v1312_v3 = vfloor.f32 %v1280_v51  ;;  %v944_v5 = vadd.f32 0.5, %v880_v9  ;;  %v899_v18 = vcvt.s32.f32 %v869_v61 }
  0xd6   : > { %vm2470_vm12 = vmpackc.low %vm1359_vm11, %vm1358_vm10  ;;  %v1313_v26 = vfloor.f32 %v1281_v34  ;;  %v945_v11 = vadd.f32 0.5, %v881_v27  ;;  %v3395_v19 = vadd.s32 112, %v3073_v24  ;;  %v3398_v12 = vadd.s32 120, %v3073_v24 }
  0xd7   : > { %2543 = vmatpush3.bf16.msk.msra.mxu1 %vm2470_vm12, %v2921_v58  ;;  %v1344_v13 = vadd.f32 %v1312_v3, %v1216_v10  ;;  %v976_v1 = vmul.f32 0.0625, %v944_v5  ;;  %v962_v14 = vadd.f32 0.5, %v898_v6  ;;  %v963_v30 = vadd.f32 0.5, %v899_v18  ;;  %vm3496_vm11 = vmpackc.low %vm431_vm0, %vm431_vm0 }
  0xd8   : > { %v1345_v55 = vadd.f32 %v1313_v26, %v1217_v62  ;;  %v977_v31 = vmul.f32 0.0625, %v945_v11  ;;  %v882_v39 = vcvt.s32.f32 %v3395_v19  ;;  %v883_v17 = vcvt.s32.f32 %v3398_v12 }
  0xd9   : > { %v1008_v59 = vfloor.f32 %v976_v1  ;;  %v994_v60 = vmul.f32 0.0625, %v962_v14  ;;  %v995_v16 = vmul.f32 0.0625, %v963_v30  ;;  %vm1376_vm13 = vcmp.eq.f32.partialorder %v1344_v13, %v3055_v4 }
  0xda   : > { %v3403_v15 = vadd.f32 %v591_v35, %v590_v54  ;;  %v3405_v46 = vadd.f32 %v582_v22, %v581_v38  ;;  %vm1377_vm14 = vcmp.eq.f32.partialorder %v1345_v55, %v3055_v4  ;;  %v1009_v24 = vfloor.f32 %v977_v31 }
  0xdb   : > { %v1040_v20 = vmul.f32 16.0, %v1008_v59  ;;  %v1104_v37 = vadd.f32 0.5, %v1008_v59  ;;  %vm2488_vm15 = vmpackc.low %vm1377_vm14, %vm1376_vm13  ;;  %v1026_v25 = vfloor.f32 %v994_v60  ;;  %v1027_v40 = vfloor.f32 %v995_v16 }
  0xdc   : > { %v946_v36 = vadd.f32 0.5, %v882_v39  ;;  %v947_v7 = vadd.f32 0.5, %v883_v17  ;;  %2544 = vmatprep.subr.msk.bf16.mxu1 %vm2488_vm15, %v2921_v58  ;;  %v1041_v54 = vmul.f32 16.0, %v1009_v24  ;;  %v1105_v38 = vadd.f32 0.5, %v1009_v24 }
  0xdd   : > { %v1072_v35 = vsub.f32 %v880_v9, %v1040_v20  ;;  %v1136_v22 = vmul.f32 0.25, %v1104_v37  ;;  %v1058_v23 = vmul.f32 16.0, %v1026_v25  ;;  %v1059_v32 = vmul.f32 16.0, %v1027_v40 }
  0xde   : > { %v1122_v33 = vadd.f32 0.5, %v1026_v25  ;;  %v1123_v41 = vadd.f32 0.5, %v1027_v40  ;;  %v1073_v42 = vsub.f32 %v881_v27, %v1041_v54  ;;  %v1137_v43 = vmul.f32 0.25, %v1105_v38 }
  0xdf   : > { %v1168_v44 = vfloor.f32 %v1136_v22  ;;  %v1232_v63 = vadd.f32 0.5, %v1072_v35  ;;  %v1090_v2 = vsub.f32 %v898_v6, %v1058_v23  ;;  %v1091_v51 = vsub.f32 %v899_v18, %v1059_v32 }
  0xe0   : > { %v1154_v53 = vmul.f32 0.25, %v1122_v33  ;;  %v1155_v61 = vmul.f32 0.25, %v1123_v41  ;;  %v1169_v10 = vfloor.f32 %v1137_v43  ;;  %v1233_v34 = vadd.f32 0.5, %v1073_v42 }
  0xe1   : > { %v1200_v62 = vmul.f32 4.0, %v1168_v44  ;;  %v1264_v3 = vmul.f32 0.25, %v1232_v63  ;;  %v1250_v26 = vadd.f32 0.5, %v1090_v2  ;;  %v1251_v11 = vadd.f32 0.5, %v1091_v51 }
  0xe2   : > { %v1186_v5 = vfloor.f32 %v1154_v53  ;;  %v1187_v9 = vfloor.f32 %v1155_v61  ;;  %v1201_v13 = vmul.f32 4.0, %v1169_v10  ;;  %v1265_v1 = vmul.f32 0.25, %v1233_v34 }
  0xe3   : > { %v1296_v14 = vfloor.f32 %v1264_v3  ;;  %v978_v30 = vmul.f32 0.0625, %v946_v36  ;;  %v1282_v31 = vmul.f32 0.25, %v1250_v26  ;;  %v1283_v59 = vmul.f32 0.25, %v1251_v11 }
  0xe4   : > { %v1218_v27 = vmul.f32 4.0, %v1186_v5  ;;  %v1219_v55 = vmul.f32 4.0, %v1187_v9  ;;  %v1297_v6 = vfloor.f32 %v1265_v1  ;;  %v979_v60 = vmul.f32 0.0625, %v947_v7 }
  0xe5   : > { %v1328_v18 = vadd.f32 %v1296_v14, %v1200_v62  ;;  %v1010_v16 = vfloor.f32 %v978_v30  ;;  %v584_v24 = vrot.slane %v3405_v46, 1  ;;  %v1314_v20 = vfloor.f32 %v1282_v31 }
  0xe6   : > { %v1315_v37 = vfloor.f32 %v1283_v59  ;;  %v1329_v25 = vadd.f32 %v1297_v6, %v1201_v13  ;;  %v1011_v40 = vfloor.f32 %v979_v60  ;;  %v593_v35 = vrot.slane %v3403_v15, 1 }
  0xe7   : > { %vm1360_vm1 = vcmp.eq.f32.partialorder %v1328_v18, %v3055_v4  ;;  %v1042_v54 = vmul.f32 16.0, %v1010_v16  ;;  %v1346_v36 = vadd.f32 %v1314_v20, %v1218_v27  ;;  %v1106_v22 = vadd.f32 0.5, %v1010_v16 }
  0xe8   : > { %v1347_v38 = vadd.f32 %v1315_v37, %v1219_v55  ;;  %vm1361_vm2 = vcmp.eq.f32.partialorder %v1329_v25, %v3055_v4  ;;  %v1043_v23 = vmul.f32 16.0, %v1011_v40  ;;  %v1107_v32 = vadd.f32 0.5, %v1011_v40 }
  0xe9   : > { %v1074_v7 = vsub.f32 %v882_v39, %v1042_v54  ;;  %vm2472_vm3 = vmpackc.low %vm1361_vm2, %vm1360_vm1  ;;  %vm1378_vm4 = vcmp.eq.f32.partialorder %v1346_v36, %v3055_v4  ;;  %v1138_v33 = vmul.f32 0.25, %v1106_v22  ;;  %v585_v41 = vadd.f32 %v584_v24, %v3405_v46 }
  0xea   : > { %vm1379_vm5 = vcmp.eq.f32.partialorder %v1347_v38, %v3055_v4  ;;  %2545 = vmatpush3.bf16.msk.msra.mxu1 %vm2472_vm3, %v2921_v58  ;;  %v1075_v42 = vsub.f32 %v883_v17, %v1043_v23  ;;  %v1139_v43 = vmul.f32 0.25, %v1107_v32  ;;  %v594_v19 = vadd.f32 %v593_v35, %v3403_v15 }
  0xeb   : > { %vm2490_vm6 = vmpackc.low %vm1379_vm5, %vm1378_vm4  ;;  %v1234_v44 = vadd.f32 0.5, %v1074_v7  ;;  %v1170_v39 = vfloor.f32 %v1138_v33  ;;  %v595_v61 = vmul.f32 0.03125, %v585_v41  ;;  %vm1540_vm10 = vcmask 261120  }
  0xec   : > { %2546 = vmatprep.subr.msk.bf16.mxu1 %vm2490_vm6, %v2921_v58  ;;  %v1171_v63 = vfloor.f32 %v1139_v43  ;;  %v1235_v2 = vadd.f32 0.5, %v1075_v42  ;;  %v596_v34 = vmul.f32 0.03125, %v594_v19 }
  0xed   : > { %v1266_v51 = vmul.f32 0.25, %v1234_v44  ;;  %v1202_v53 = vmul.f32 4.0, %v1170_v39  ;;  %v597_v12 = vadd.f32 1e-05, %v595_v61 }
  0xee   : > { %v1203_v10 = vmul.f32 4.0, %v1171_v63  ;;  %v1267_v46 = vmul.f32 0.25, %v1235_v2  ;;  %v598_v9 = vadd.f32 1e-05, %v596_v34 }
  0xef   : > { %v1298_v62 = vfloor.f32 %v1266_v51  ;;  %2820 = vrsqrt.f32 %v597_v12  ;;  %v1460_v12 = vld [vmem:[#allocation2] sm:$0xff] }
  0xf0   : > { %v1299_v3 = vfloor.f32 %v1267_v46  ;;  %2822 = vrsqrt.f32 %v598_v9 }
  0xf1   : > { %v1330_v5 = vadd.f32 %v1298_v62, %v1202_v53 }
  0xf2   : > { %v1331_v17 = vadd.f32 %v1299_v3, %v1203_v10  ;;  %v1532_v3 = vld [vmem:[%s3650_s4] sm:$0xff] }
  0xf3   : > { %vm1362_vm7 = vcmp.eq.f32.partialorder %v1330_v5, %v3055_v4  ;;  %2620 = vmatprep.mubr.msk.f32.mxu0 %vm1540_vm10, %v1532_v3 }
  0xf4   : > { %vm1363_vm8 = vcmp.eq.f32.partialorder %v1331_v17, %v3055_v4 }
  0xf5   : > { %vm2474_vm9 = vmpackc.low %vm1363_vm8, %vm1362_vm7 }
  0xf6   : > { %2547 = vmatpush3.bf16.msk.msra.mxu1 %vm2474_vm9, %v2921_v58 }
  0xf9   : > { %v2821_v11 = vpop.eup %2820 }
  0xfa   : > { %v2823_v13 = vpop.eup %2822  ;;  %v601_v30 = vmul.f32 %v2821_v11, %v3341_v45  ;;  %v603_v55 = vmul.f32 %v2821_v11, %v3344_v49  ;;  %v605_v38 = vmul.f32 %v2821_v11, %v3347_v0 }
  0xfb   : > { %v617_v15 = vpop.permute.xlu1 %616  ;;  %v602_v27 = vmul.f32 %v2823_v13, %v3332_v50  ;;  %v604_v4 = vmul.f32 %v2823_v13, %v3335_v52  ;;  %v607_v52 = vmul.f32 %v2821_v11, %v3363_v56  ;;  %v606_v7 = vmul.f32 %v2823_v13, %v3338_v57 }
  0xfc   : > { %v631_v18 = vmul.f32 %v617_v15, %v603_v55  ;;  %v608_v32 = vmul.f32 %v2823_v13, %v3360_v21 }
  0xfd   : > { %v632_v16 = vmul.f32 %v617_v15, %v604_v4 }
  0xff   : > { %v640_v26 = vpop.permute.xlu1 %639 }
 0x103   : > { %v645_v1 = vpop.permute.xlu1 %644 }
 0x104   : > { %v659_v20 = vadd.f32 %v645_v1, %v631_v18  ;;  %v660_v25 = vadd.f32 %v645_v1, %v632_v16 }
 0x105   : > { %v612_v14 = vpop.permute.xlu0 %611 }
 0x106   : > { %v629_v31 = vmul.f32 %v612_v14, %v601_v30  ;;  %v630_v59 = vmul.f32 %v612_v14, %v602_v27  ;;  %v1462_v27 = vld [vmem:[#allocation2 + $0x10] sm:$0xff] }
 0x107   : > { %v622_v60 = vpop.permute.xlu1 %621 }
 0x108   : > { %v657_v37 = vadd.f32 %v640_v26, %v629_v31  ;;  %v658_v40 = vadd.f32 %v640_v26, %v630_v59  ;;  %v633_v43 = vmul.f32 %v622_v60, %v605_v38  ;;  %v634_v39 = vmul.f32 %v622_v60, %v606_v7  ;;  %v1461_v26 = vld [vmem:[#allocation2 + $0x8] sm:$0xff]  ;;  %v1463_v59 = vld [vmem:[#allocation2 + $0x18] sm:$0xff] }
 0x109   : > { %v627_v24 = vpop.permute.xlu0 %626  ;;  %v1539_v38 = vld [vmem:[%s3650_s4 + $0x38] sm:$0xff] }
 0x10a   : > { %v809_v6 = vpop.f32.mrb[0].mxu0  ;;  %v635_v44 = vmul.f32 %v627_v24, %v607_v52  ;;  %v636_v63 = vmul.f32 %v627_v24, %v608_v32 }
 0x10b   : > { %v811_v58 = vpop.f32.mrb[1].mxu0  ;;  %v832_v45 = vmul.f32 %v809_v6, %v657_v37  ;;  %v650_v22 = vpop.permute.xlu1 %649 }
 0x10c   : > { %v833_v36 = vmul.f32 %v811_v58, %v658_v40  ;;  %v661_v2 = vadd.f32 %v650_v22, %v633_v43  ;;  %v662_v0 = vadd.f32 %v650_v22, %v634_v39 }
 0x10d   : > { %v655_v33 = vpop.permute.xlu0 %654 }
 0x10e   : > { %v815_v54 = vpop.f32.mrb[2].mxu0  ;;  %v663_v51 = vadd.f32 %v655_v33, %v635_v44  ;;  %v664_v56 = vadd.f32 %v655_v33, %v636_v63 }
 0x10f   : > { %v834_v35 = vmul.f32 %v815_v54, %v659_v20  ;;  %v817_v50 = vpop.f32.mrb[3].mxu0  ;;  %v1533_v54 = vld [vmem:[%s3650_s4 + $0x8] sm:$0xff] }
 0x110   : > { %v835_v49 = vmul.f32 %v817_v50, %v660_v25  ;;  %v1536_v50 = vld [vmem:[%s3650_s4 + $0x20] sm:$0xff] }
 0x111   : > { %v1464_v23 = vpack.c.bf16 %v834_v35, %v832_v45  ;;  %v1534_v45 = vld [vmem:[%s3650_s4 + $0x10] sm:$0xff]  ;;  %v1535_v35 = vld [vmem:[%s3650_s4 + $0x18] sm:$0xff] }
 0x112   : > { %v821_v41 = vpop.f32.mrb[4].mxu0  ;;  %v1465_v42 = vpack.c.bf16 %v835_v49, %v833_v36  ;;  %v1537_v36 = vld [vmem:[%s3650_s4 + $0x28] sm:$0xff]  ;;  %v1538_v49 = vld [vmem:[%s3650_s4 + $0x30] sm:$0xff] }
 0x113   : > { %v823_v19 = vpop.f32.mrb[5].mxu0  ;;  %v836_v61 = vmul.f32 %v821_v41, %v661_v2 }
 0x114   : > { %1500 = vmatprep.mubr.bf16.mxu1 %v1465_v42  ;;  %v837_v46 = vmul.f32 %v823_v19, %v662_v0 }
 0x115   : > { %1501 = vmatmul.mubr.bf16.vlgmr.msra.gmra.mrb[0].mxu1 %v1464_v23 }
 0x116   : > { %v827_v53 = vpop.f32.mrb[6].mxu0 }
 0x117   : > { %v838_v10 = vmul.f32 %v827_v53, %v663_v51  ;;  %v829_v57 = vpop.f32.mrb[7].mxu0 }
 0x118   : > { %v839_v21 = vmul.f32 %v829_v57, %v664_v56 }
 0x119   : > { %v1466_v62 = vpack.c.bf16 %v838_v10, %v836_v61 }
 0x11a   : > { %v1467_v34 = vpack.c.bf16 %v839_v21, %v837_v46 }
 0x11c   : > { %1508 = vmatprep.mubr.bf16.mxu1 %v1467_v34 }
 0x11d   : > { %1509 = vmatmul.mubr.bf16.gmra.mrb[4].mxu1 %v1466_v62 }
 0x1e8   : > { %v2548_v5 = vpop.f32.mrb[0].mxu1 }
 0x1e9   : > { %v2549_v17 = vpop.f32.mrb[1].mxu1 }
 0x1ea   : > { %v2550_v9 = vadd.f32 %v2549_v17, %v2548_v5  ;;  %v2551_v15 = vpop.f32.mrb[2].mxu1  ;;  %v1671_v17 = vld [vmem:[%s3651_s5 + $0x8] sm:$0xff] }
 0x1eb   : > { %v2552_v11 = vpop.f32.mrb[3].mxu1 }
 0x1ec   : > { %v1517_v13 = vadd.f32 %v2550_v9, %v1460_v12  ;;  %v2553_v1 = vadd.f32 %v2552_v11, %v2551_v15  ;;  %v1672_v15 = vld [vmem:[%s3651_s5 + $0x10] sm:$0xff] }
 0x1ee   : > { %1521 = vst.msk [vmem:[#allocation2] sm:$0xff] %vm431_vm0, %v1517_v13  ;;  %v1518_v14 = vadd.f32 %v2553_v1, %v1461_v26  ;;  %v1670_v13 = vld [vmem:[%s3651_s5] sm:$0xff] }
 0x1f0   : > { %1522 = vst.msk [vmem:[#allocation2 + $0x8] sm:$0xff] %vm431_vm0, %v1518_v14  ;;  %v2554_v30 = vpop.f32.mrb[4].mxu1  ;;  %v1673_v14 = vld [vmem:[%s3651_s5 + $0x18] sm:$0xff] }
 0x1f1   : > { %v2555_v55 = vpop.f32.mrb[5].mxu1 }
 0x1f2   : > { %v2556_v31 = vadd.f32 %v2555_v55, %v2554_v30  ;;  %v2557_v4 = vpop.f32.mrb[6].mxu1 }
 0x1f3   : > { %v2558_v6 = vpop.f32.mrb[7].mxu1 }
 0x1f4   : > { %v1519_v18 = vadd.f32 %v2556_v31, %v1462_v27  ;;  %v2559_v60 = vadd.f32 %v2558_v6, %v2557_v4 }
 0x1f5   : > { %v1528_v16 = vld [vmem:[#allocation2] sm:$0xff] }
 0x1f6   : > { %1523 = vst.msk [vmem:[#allocation2 + $0x10] sm:$0xff] %vm431_vm0, %v1519_v18  ;;  %v1520_v58 = vadd.f32 %v2559_v60, %v1463_v59 }
 0x1f7   : > { %v1529_v24 = vld [vmem:[#allocation2 + $0x8] sm:$0xff] }
 0x1f8   : > { %1524 = vst.msk [vmem:[#allocation2 + $0x18] sm:$0xff] %vm431_vm0, %v1520_v58  ;;  %v2706_v20 = vpack.c.bf16 %v1529_v24, %v1528_v16 }
 0x1fa   : > { %2707 = vmatprep.subr.bf16.mxu0 %v2706_v20 }
 0x1fb   : > { %2709 = vmatpush3.bf16.msra.mxu0 %v2706_v20 }
 0x1fd   : > { %v1530_v37 = vld [vmem:[#allocation2 + $0x10] sm:$0xff] }
 0x1ff   : > { %v1531_v25 = vld [vmem:[#allocation2 + $0x18] sm:$0xff] }
 0x200   : > { %v2710_v40 = vpack.c.bf16 %v1531_v25, %v1530_v37 }
 0x202   : > { %2711 = vmatprep.subr.bf16.mxu0 %v2710_v40 }
 0x203   : > { %2713 = vmatpush3.bf16.msra.mxu0 %v2710_v40 }
 0x206   : > { %2621 = vmatmul.mubr.msk.f32.vlgmr.msra.gmra.mrb[8].mxu0 %vm1540_vm10, %v1533_v54 }
 0x207   : > { %2623 = vmatprep.mubr.msk.f32.mxu0 %vm1540_vm10, %v1534_v45  ;;  %v1878_v45 = vld [vmem:[%s3652_s6] sm:$0xff] }
 0x20a   : > { %2624 = vmatmul.mubr.msk.f32.gmra.mrb[10].mxu0 %vm1540_vm10, %v1535_v35  ;;  %v1879_v35 = vld [vmem:[%s3652_s6 + $0x8] sm:$0xff] }
 0x20b   : > { %2626 = vmatprep.mubr.msk.f32.mxu0 %vm1540_vm10, %v1536_v50 }
 0x20e   : > { %2627 = vmatmul.mubr.msk.f32.gmra.mrb[12].mxu0 %vm1540_vm10, %v1537_v36  ;;  %v2726_v36 = vpack.c.bf16 %v1879_v35, %v1878_v45 }
 0x20f   : > { %2629 = vmatprep.mubr.msk.f32.mxu0 %vm1540_vm10, %v1538_v49 }
 0x212   : > { %2630 = vmatmul.mubr.msk.f32.gmra.mrb[14].mxu0 %vm1540_vm10, %v1539_v38 }
 0x2d9   : > { %v2622_v52 = vpop.f32.mrb[8].mxu0 }
 0x2da   : > { %v1631_v22 = vpop.f32.mrb[9].mxu0  ;;  %v1701_v23 = vsel %vm431_vm0, %v2622_v52, -inf }
 0x2db   : > { %1702 = vmax.xlane.f32.xlu0 %v1701_v23  ;;  %v1698_v7 = vsel %vm431_vm0, %v1631_v22, -inf }
 0x2dc   : > { %1699 = vmax.xlane.f32.xlu1 %v1698_v7  ;;  %v1880_v7 = vld [vmem:[%s3652_s6 + $0x10] sm:$0xff] }
 0x2dd   : > { %v2625_v32 = vpop.f32.mrb[10].mxu0 }
 0x2de   : > { %v1641_v33 = vpop.f32.mrb[11].mxu0  ;;  %v1707_v41 = vsel %vm431_vm0, %v2625_v32, -inf }
 0x2df   : > { %v1704_v42 = vsel %vm431_vm0, %v1641_v33, -inf }
 0x2e0   : > { %1708 = vmax.xlane.f32.xlu1 %v1707_v41  ;;  %1705 = vmax.xlane.f32.xlu0 %v1704_v42  ;;  %v2084_v41 = vld [vmem:[%s3653_s7] sm:$0xff]  ;;  %v2085_v42 = vld [vmem:[%s3653_s7 + $0x8] sm:$0xff] }
 0x2e1   : > { %v2628_v9 = vpop.f32.mrb[12].mxu0 }
 0x2e2   : > { %v1651_v26 = vpop.f32.mrb[13].mxu0 }
 0x2e5   : > { %v2631_v11 = vpop.f32.mrb[14].mxu0 }
 0x2e6   : > { %v1661_v1 = vpop.f32.mrb[15].mxu0 }
 0x368   : > { %v1703_v43 = vpop.xlane.xlu0 %1702 }
 0x369   : > { %v1711_v44 = vsub.f32 %v2622_v52, %v1703_v43  ;;  %v1700_v19 = vpop.xlane.xlu1 %1699  ;;  %v2742_v43 = vpack.c.bf16 %v2085_v42, %v2084_v41 }
 0x36a   : > { %v1710_v39 = vsub.f32 %v1631_v22, %v1700_v19  ;;  %v1864_v19 = vmul.f32 0.25, %v3065_v8  ;;  %v2086_v8 = vld [vmem:[%s3653_s7 + $0x10] sm:$0xff] }
 0x36b   : > { %v1716_v63 = vmul.f32 1.442695, %v1711_v44  ;;  %v1856_v44 = vmul.f32 0.25, %v3144_v29 }
 0x36c   : > { %v1714_v2 = vmul.f32 1.442695, %v1710_v39  ;;  %v1855_v39 = vmul.f32 0.25, %v3141_v28  ;;  %v2087_v28 = vld [vmem:[%s3653_s7 + $0x18] sm:$0xff] }
 0x36d   : > { %2824 = vpow2.f32 %v1716_v63  ;;  %v1709_v51 = vpop.xlane.xlu1 %1708  ;;  %v1706_v0 = vpop.xlane.xlu0 %1705  ;;  %v1860_v63 = vfloor.f32 %v1856_v44 }
 0x36e   : > { %2826 = vpow2.f32 %v1714_v2  ;;  %v1713_v56 = vsub.f32 %v2625_v32, %v1709_v51  ;;  %v1712_v53 = vsub.f32 %v1641_v33, %v1706_v0  ;;  %v1881_v32 = vld [vmem:[%s3652_s6 + $0x18] sm:$0xff]  ;;  %v1865_v2 = vfloor.f32 %v1864_v19 }
 0x36f   : > { %v2730_v33 = vpack.c.bf16 %v1881_v32, %v1880_v7  ;;  %v1858_v51 = vmul.f32 0.25, %v3168_v48  ;;  %v1859_v0 = vfloor.f32 %v1855_v39 }
 0x370   : > { %v1720_v61 = vmul.f32 1.442695, %v1713_v56  ;;  %v1718_v10 = vmul.f32 1.442695, %v1712_v53  ;;  %v1857_v56 = vmul.f32 0.25, %v3164_v47 }
 0x371   : > { %v1862_v53 = vfloor.f32 %v1858_v51  ;;  %vm1866_vm12 = vcmp.eq.f32.partialorder %v1859_v0, %v1865_v2 }
 0x372   : > { %2828 = vpow2.f32 %v1720_v61  ;;  %v1861_v61 = vfloor.f32 %v1857_v56 }
 0x373   : > { %2830 = vpow2.f32 %v1718_v10  ;;  %vm1869_vm13 = vcmp.eq.f32.partialorder %v1862_v53, %v1865_v2 }
 0x374   : > { %vm1868_vm14 = vcmp.eq.f32.partialorder %v1861_v61, %v1865_v2 }
 0x377   : > { %v2825_v57 = vpop.eup %2824 }
 0x378   : > { %v2827_v46 = vpop.eup %2826  ;;  %v1725_v21 = vsel %vm431_vm0, %v2825_v57, 0.0 }
 0x379   : > { %1726 = vadd.xlane.f32.xlu1 %v1725_v21  ;;  %v1722_v62 = vsel %vm431_vm0, %v2827_v46, 0.0 }
 0x37a   : > { %1723 = vadd.xlane.f32.xlu0 %v1722_v62  ;;  %v2746_v62 = vpack.c.bf16 %v2087_v28, %v2086_v8 }
 0x37c   : > { %v2829_v34 = vpop.eup %2828 }
 0x37d   : > { %v2831_v3 = vpop.eup %2830  ;;  %v1731_v5 = vsel %vm431_vm0, %v2829_v34, 0.0 }
 0x37e   : > { %1732 = vadd.xlane.f32.xlu1 %v1731_v5  ;;  %v1728_v12 = vsel %vm431_vm0, %v2831_v3, 0.0 }
 0x37f   : > { %1729 = vadd.xlane.f32.xlu0 %v1728_v12 }
 0x38f   : > { %1681 = vperm.xlu1 %2819, %v1671_v17  }
 0x393   : > { %1686 = vperm.xlu1 %2819, %v1672_v15  }
 0x395   : > { %1676 = vperm.xlu0 %2818, %v1670_v13  }
 0x399   : > { %1691 = vperm.xlu0 %2818, %v1673_v14  }
 0x406   : > { %v1727_v30 = vpop.xlane.xlu1 %1726 }
 0x407   : > { %2832 = vrcp.f32 %v1727_v30  ;;  %v1724_v27 = vpop.xlane.xlu0 %1723 }
 0x408   : > { %2834 = vrcp.f32 %v1724_v27 }
 0x40b   : > { %v1733_v55 = vpop.xlane.xlu1 %1732 }
 0x40c   : > { %2836 = vrcp.f32 %v1733_v55  ;;  %v1730_v31 = vpop.xlane.xlu0 %1729  ;;  %v1980_v55 = vld [vmem:[%s3654_s8 + $0x8] sm:$0xff] }
 0x40d   : > { %2838 = vrcp.f32 %v1730_v31 }
 0x40f   : > { %v1682_v50 = vpop.permute.xlu1 %1681 }
 0x410   : > { %v1695_v38 = vadd.f32 %v2628_v9, %v1682_v50  ;;  %v1979_v9 = vld [vmem:[%s3654_s8] sm:$0xff] }
 0x411   : > { %v2833_v4 = vpop.eup %2832  ;;  %2668 = vmatprep.mubr.msk.f32.mxu1 %vm1540_vm10, %v1979_v9 }
 0x412   : > { %v2835_v59 = vpop.eup %2834  ;;  %v1739_v6 = vmul.f32 %v2833_v4, %v2825_v57  ;;  %v1981_v4 = vld [vmem:[%s3654_s8 + $0x10] sm:$0xff] }
 0x413   : > { %v1738_v18 = vmul.f32 %v2835_v59, %v2827_v46  ;;  %v1687_v49 = vpop.permute.xlu1 %1686 }
 0x414   : > { %v1677_v60 = vpop.permute.xlu0 %1676  ;;  %v1696_v52 = vadd.f32 %v1687_v49, %v1661_v1 }
 0x415   : > { %v1694_v16 = vadd.f32 %v1677_v60, %v1651_v26  ;;  %v2714_v24 = vpack.c.bf16 %v1739_v6, %v1738_v18  ;;  %v1982_v18 = vld [vmem:[%s3654_s8 + $0x18] sm:$0xff] }
 0x416   : > { %v2837_v20 = vpop.eup %2836 }
 0x417   : > { %v2839_v37 = vpop.eup %2838  ;;  %2640 = vmatprep.mubr.msk.f32.mxu0 %vm431_vm0, %v1694_v16  ;;  %2716 = vmatprep.subr.msk.bf16.mxu0 %vm3496_vm11, %v2714_v24  ;;  %v1741_v25 = vmul.f32 %v2837_v20, %v2829_v34 }
 0x418   : > { %2719 = vmatpush3.bf16.xpose.msk.msra.mxu0 %vm3496_vm11, %v2714_v24  ;;  %v1740_v40 = vmul.f32 %v2839_v37, %v2831_v3  ;;  %v1692_v22 = vpop.permute.xlu0 %1691  ;;  %v2178_v37 = vld [vmem:[%s3655_s9 + $0x8] sm:$0xff] }
 0x419   : > { %v1697_v23 = vadd.f32 %v2631_v11, %v1692_v22 }
 0x41a   : > { %v2720_v54 = vpack.c.bf16 %v1741_v25, %v1740_v40  ;;  %v2177_v25 = vld [vmem:[%s3655_s9] sm:$0xff] }
 0x41c   : > { %2722 = vmatprep.subr.msk.bf16.mxu0 %vm3496_vm11, %v2720_v54 }
 0x420   : > { %2725 = vmatpush3.bf16.xpose.msk.msra.mxu0 %vm3496_vm11, %v2720_v54 }
 0x421   : > { %2727 = vmatprep.subr.bf16.mxu0 %v2726_v36 }
 0x427   : > { %2641 = vmatmul.mubr.msk.f32.vlgmr.msra.gmra.mrb[16].mxu0 %vm431_vm0, %v1695_v38 }
 0x428   : > { %2643 = vmatprep.mubr.msk.f32.mxu0 %vm431_vm0, %v1696_v52  ;;  %2729 = vmatpush3.bf16.msra.mxu0 %v2726_v36 }
 0x429   : > { %2731 = vmatprep.subr.bf16.mxu0 %v2730_v33 }
 0x42b   : > { %2644 = vmatmul.mubr.msk.f32.gmra.mrb[18].mxu0 %vm431_vm0, %v1697_v23  ;;  %vm1867_vm0 = vcmp.eq.f32.partialorder %v1860_v63, %v1865_v2 }
 0x42c   : > { %2733 = vmatpush3.bf16.msra.mxu0 %v2730_v33 }
 0x42d   : > { %2743 = vmatprep.subr.bf16.mxu0 %v2742_v43 }
 0x4fa   : > { %v2642_v10 = vpop.f32.mrb[16].mxu0 }
 0x4fb   : > { %v1871_v57 = vsel %vm1867_vm0, %v2642_v10, 0.0  ;;  %v1832_v46 = vpop.f32.mrb[17].mxu0 }
 0x4fc   : > { %v1870_v29 = vsel %vm1866_vm12, %v1832_v46, 0.0  ;;  %v1875_v47 = vmul.f32 0.5, %v1871_v57 }
 0x4fd   : > { %v1874_v48 = vmul.f32 0.5, %v1870_v29 }
 0x4fe   : > { %v2645_v21 = vpop.f32.mrb[18].mxu0 }
 0x4ff   : > { %v1873_v34 = vsel %vm1869_vm13, %v2645_v21, 0.0  ;;  %v1842_v3 = vpop.f32.mrb[19].mxu0  ;;  %2654 = vmatprep.mubr.msk.f32.mxu0 %vm1540_vm10, %v1874_v48 }
 0x500   : > { %v1872_v5 = vsel %vm1868_vm14, %v1842_v3, 0.0  ;;  %2655 = vmatmul.mubr.msk.f32.vlgmr.msra.gmra.mrb[20].mxu0 %vm1540_vm10, %v1875_v47  ;;  %v1877_v17 = vmul.f32 0.5, %v1873_v34 }
 0x501   : > { %v1876_v12 = vmul.f32 0.5, %v1872_v5  ;;  %2745 = vmatpush3.bf16.msra.mxu0 %v2742_v43 }
 0x502   : > { %2747 = vmatprep.subr.bf16.mxu0 %v2746_v62 }
 0x503   : > { %2657 = vmatprep.mubr.msk.f32.mxu0 %vm1540_vm10, %v1876_v12 }
 0x504   : > { %2658 = vmatmul.mubr.msk.f32.gmra.mrb[22].mxu0 %vm1540_vm10, %v1877_v17 }
 0x505   : > { %2749 = vmatpush3.bf16.msra.mxu0 %v2746_v62  ;;  %2682 = vmatprep.mubr.msk.f32.mxu0 %vm1540_vm10, %v1874_v48 }
 0x508   : > { %2683 = vmatmul.mubr.msk.f32.vlgmr.msra.gmra.mrb[24].mxu0 %vm1540_vm10, %v1875_v47 }
 0x509   : > { %2685 = vmatprep.mubr.msk.f32.mxu0 %vm1540_vm10, %v1876_v12 }
 0x50c   : > { %2686 = vmatmul.mubr.msk.f32.gmra.mrb[26].mxu0 %vm1540_vm10, %v1877_v17 }
 0x5d3   : > { %v2656_v15 = vpop.f32.mrb[20].mxu0 }
 0x5d4   : > { %v1960_v26 = vpop.f32.mrb[21].mxu0 }
 0x5d5   : > { %v2734_v11 = vpack.c.bf16 %v2656_v15, %v1960_v26 }
 0x5d7   : > { %v2659_v13 = vpop.f32.mrb[22].mxu0  ;;  %2735 = vmatprep.subr.bf16.mxu1 %v2734_v11 }
 0x5d8   : > { %v1970_v1 = vpop.f32.mrb[23].mxu0  ;;  %2737 = vmatpush3.bf16.msra.mxu1 %v2734_v11 }
 0x5d9   : > { %v2738_v14 = vpack.c.bf16 %v2659_v13, %v1970_v1 }
 0x5db   : > { %2739 = vmatprep.subr.bf16.mxu1 %v2738_v14  ;;  %v2684_v30 = vpop.f32.mrb[24].mxu0 }
 0x5dc   : > { %2741 = vmatpush3.bf16.msra.mxu1 %v2738_v14  ;;  %v2154_v27 = vpop.f32.mrb[25].mxu0 }
 0x5dd   : > { %v2750_v31 = vpack.c.bf16 %v2684_v30, %v2154_v27 }
 0x5df   : > { %v2687_v59 = vpop.f32.mrb[26].mxu0  ;;  %2751 = vmatprep.subr.bf16.mxu1 %v2750_v31  ;;  %2669 = vmatmul.mubr.msk.f32.vlgmr.msra.gmra.mrb[8].mxu1 %vm1540_vm10, %v1980_v55 }
 0x5e0   : > { %v2164_v6 = vpop.f32.mrb[27].mxu0  ;;  %2753 = vmatpush3.bf16.msra.mxu1 %v2750_v31  ;;  %2671 = vmatprep.mubr.msk.f32.mxu1 %vm1540_vm10, %v1981_v4 }
 0x5e1   : > { %v2754_v60 = vpack.c.bf16 %v2687_v59, %v2164_v6 }
 0x5e3   : > { %2755 = vmatprep.subr.bf16.mxu1 %v2754_v60  ;;  %2672 = vmatmul.mubr.msk.f32.gmra.mrb[10].mxu1 %vm1540_vm10, %v1982_v18 }
 0x5e4   : > { %2757 = vmatpush3.bf16.msra.mxu1 %v2754_v60  ;;  %2696 = vmatprep.mubr.msk.f32.mxu1 %vm1540_vm10, %v1979_v9 }
 0x5e7   : > { %2697 = vmatmul.mubr.msk.f32.vlgmr.msra.gmra.mrb[12].mxu1 %vm1540_vm10, %v1980_v55 }
 0x5e8   : > { %2699 = vmatprep.mubr.msk.f32.mxu1 %vm1540_vm10, %v1981_v4 }
 0x5eb   : > { %2700 = vmatmul.mubr.msk.f32.gmra.mrb[14].mxu1 %vm1540_vm10, %v1982_v18 }
 0x6b2   : > { %v2670_v58 = vpop.f32.mrb[8].mxu1 }
 0x6b3   : > { %2081 = vst.msk [vmem:[%s403_s26 + $0x8] sm:$0xff] %vm1540_vm10, %v2670_v58  ;;  %v2061_v16 = vpop.f32.mrb[9].mxu1 }
 0x6b4   : > { %2080 = vst.msk [vmem:[%s403_s26] sm:$0xff] %vm1540_vm10, %v2061_v16 }
 0x6b6   : > { %v2673_v24 = vpop.f32.mrb[10].mxu1 }
 0x6b7   : > { %2083 = vst.msk [vmem:[%s403_s26 + $0x18] sm:$0xff] %vm1540_vm10, %v2673_v24  ;;  %v2071_v20 = vpop.f32.mrb[11].mxu1 }
 0x6b8   : > { %2082 = vst.msk [vmem:[%s403_s26 + $0x10] sm:$0xff] %vm1540_vm10, %v2071_v20 }
 0x6b9   : > { %2853 = shalt.err (!%p2850_p5)
}
 0x6ba   : > { %s2854_s0 = scalar_lea.hbm %s3578_s23, 512  ;;  %s2858_s16 = scalar_lea.hbm %s3656_s10, 1024 }
 0x6bb   : > { %p2855_p6 = scmp.ne.s32.totalorder %s3578_s23, %s2854_s0  ;;  %p2859_p10 = scmp.lt.u32.totalorder %s3578_s23, %s3656_s10 }
 0x6bc   : > { %p2860_p11 = scmp.lt.u32.totalorder %s2858_s16, %s2854_s0  ;;  %p2862_p13 = scmp.lt.u32.totalorder %s2854_s0, %s3578_s23 }
 0x6bd   : > { %p2856_p7 = pnand %p2855_p6, %p3026_p4 }
 0x6be   : > { %p2861_p12 = por %p2860_p11, %p2859_p10 }
 0x6bf   : > { %p2857_p9 = pneg %p2856_p7 }
 0x6c0   : > { %p2863_p0 = por %p2862_p13, %p2861_p12 }
 0x6c2   : > { %p2864_p1 = pnand %p2863_p0, %p2857_p9 }
 0x6c4   : > { %2867 = shalt.err (!%p2864_p1)
}
 0x6c5   : > { %s2924_s20 = smov 128   ;;  %s2925_s24 = smov 8   ;;  %v2698_v40 = vpop.f32.mrb[12].mxu1  ;;  %vm2278_vm15 = vcmask 7168   ;;  %v2180_v50 = vld [vmem:[%s3655_s9 + $0x18] sm:$0xff]  ;;  %v2179_v36 = vld [vmem:[%s3655_s9 + $0x10] sm:$0xff] }
 0x6c6   : > { %2758 = dma.vmem_to_hbm [thread:$0]  (%p3026_p4), %s3573_s28, 512, %s3578_s23, %s3589_s14, %s2924_s20, %s2924_s20, %s2925_s24   ;;  %v2265_v54 = vadd.f32 %v2698_v40, %v2178_v37  ;;  %v2259_v45 = vpop.f32.mrb[13].mxu1 }
 0x6c7   : > { %s3670_s13 = sshll.u32 %s3052_s12, 5  ;;  %v2260_v35 = vadd.f32 %v2259_v45, %v2177_v25  ;;  %v2701_v49 = vpop.f32.mrb[14].mxu1 }
 0x6c8   : > { %s425_s2 = scalar_lea.vmem %s3657_s11, %s3670_s13  ;;  %v2275_v38 = vadd.f32 %v2701_v49, %v2180_v50  ;;  %v2269_v52 = vpop.f32.mrb[15].mxu1 }
 0x6c9   : > { %2280 = vst.msk [vmem:[%s425_s2 + $0x8] sm:$0xff] %vm2278_vm15, %v2265_v54  ;;  %2279 = vst.msk [vmem:[%s425_s2] sm:$0xff] %vm2278_vm15, %v2260_v35  ;;  %v2270_v22 = vadd.f32 %v2269_v52, %v2179_v36 }
 0x6ca   : > { %2282 = vst.msk [vmem:[%s425_s2 + $0x18] sm:$0xff] %vm2278_vm15, %v2275_v38 }
 0x6cb   : > { %2281 = vst.msk [vmem:[%s425_s2 + $0x10] sm:$0xff] %vm2278_vm15, %v2270_v22 }
 0x6cc PF: > { %p2764_p4 = scmp.ge.s32.totalorder %s2918_s22, 2  ;;  %s2320_s27 = sand.u32 1, %s2898_s17  }
 0x6cd   : > { %s2321_s12 = scalar_lea.sflag [#allocation4], %s2320_s27 }
 0x6ce   : > { %p2761_p2 = pnand %p2764_p4, %p3033_p8 }
 0x6d0   : > { %2893 = dma.done.wait (!%p2761_p2), %s2321_s12, 512  }
 0x6d1   : > { %2895 = vsyncadd (!%p2761_p2), %s2321_s12, 4294966784  ;;  %s25_s22 = sadd.s32 1, %s2918_s22   ;;  %s3671_s17 = smov %s2902_s18 }
 0x6d2   : > { %p22_p3 = scmp.ge.s32.totalorder %s25_s22, 4   ;;  %s3672_s18 = smov %s2906_s19 }
 0x6d3   : > { %s3673_s19 = smov %s3039_s30  ;;  %s3674_s20 = smov %s2914_s21 }
 0x6d4   : > { %s3675_s21 = smov %s3677_s25  ;;  %24 = sbr.rel (!%p22_p3) target bundleno = 9 (0x9), region = 115 }
 0x6db   :  { %2334 = vsyncpa [#allocation4], 1 }
 0x6dc   :  { %2336 = vsyncpa [#allocation4 + $0x1], 1 }

</bundles_post_ra>
